<compile_context>
chip_gen: v7x
topology: tpu7x:2x2x1
jax: 0.10.0
libtpu: 0.0.40
codegen_flags: <defaults>
</compile_context>

<pallas_src>
import jax
import jax.numpy as jnp
import numpy as np
from jax.experimental import pallas as pl
from jax.experimental.pallas import tpu as pltpu


_POOL_HW = 12        # pooled spatial extent (12x12)
_LANE_POOL = 256     # padded lane width of the pooled activation
_LANE_C2 = 144       # conv2-output lane width (flat index h*12 + w)


# ----------------------------------------------------------------------------
# Fused kernel: one grid step == one example
# ----------------------------------------------------------------------------
def _fpganet_kernel(xph_ref, w1m_ref, b1_ref, w2t_ref, b2_ref,
                    wl1_ref, bl1_ref, wl2_ref, bl2_ref, out_ref, pool_ref):
    f32 = jnp.float32
    bf16 = jnp.bfloat16

    # ---- conv1 (one matmul per pooling phase) + ReLU + fused 2x2 max-pool --
    w1m = w1m_ref[...]                                   # (8, 25)  (rows 6,7 = 0)
    b1 = b1_ref[...]                                     # (8, 1)
    pooled = None
    for p in range(4):                                   # 4 pooling phases
        xp = xph_ref[0, p]                               # (25, 256): rows = taps
        h = jnp.dot(w1m, xp, preferred_element_type=f32) + b1   # (8, 256)
        h = jnp.maximum(h, 0.0)
        pooled = h if pooled is None else jnp.maximum(pooled, h)
    pool_ref[...] = pooled                               # lanes = ii*12 + jj

    # ---- conv2: sum of 9 tap matmuls over lane-shifted pooled rows + ReLU --
    acc2 = jnp.zeros((10, _LANE_C2), f32)
    for di in range(3):
        for dj in range(3):
            delta = di * _POOL_HW + dj
            shifted = pool_ref[:, delta:delta + _LANE_C2]        # (8, 144)
            acc2 = acc2 + jnp.dot(w2t_ref[di * 3 + dj], shifted,
                                  preferred_element_type=f32)    # (10, 144)
    a2 = jnp.maximum(acc2 + b2_ref[...], 0.0)            # (10, 144); lanes h*12+w

    # ---- fc1: y1 = relu(sum_c a2[c] @ wl1p[c] + bl1)  (bf16 x bf16 -> f32) --
    acc = jnp.zeros((1, 200), f32)
    for c in range(10):
        row = a2[c:c + 1, :].astype(bf16)                # (1, 144)
        acc = acc + jnp.dot(row, wl1_ref[c], preferred_element_type=f32)
    y1 = jnp.maximum(acc + bl1_ref[...], 0.0).astype(bf16)       # (1, 200)

    # ---- fc2 ----------------------------------------------------------------
    y2 = jnp.dot(y1, wl2_ref[...], preferred_element_type=f32) + bl2_ref[...]
    out_ref[0] = y2.astype(out_ref.dtype)                # (1, 10)


# ----------------------------------------------------------------------------
# Wrapper-side layout prep (pure XLA reshapes/slices, done once per call)
# ----------------------------------------------------------------------------
def _prep_params(params):
    w1, b1, w2, b2, wl1, bl1, wl2, bl2 = params
    f32 = jnp.float32
    # conv1 as (oc, tap) matrix; pad oc 6 -> 8 rows with zeros.
    w1m = jnp.pad(w1.reshape(6, 25).astype(f32), ((0, 2), (0, 0)))        # (8, 25)
    b1v = jnp.pad(b1.reshape(6, 1).astype(f32), ((0, 2), (0, 0)))         # (8, 1)
    # conv2 per-tap (oc, ic) matrices; pad ic 6 -> 8 with zeros.
    w2t = w2.transpose(2, 3, 0, 1).reshape(9, 10, 6).astype(f32)
    w2t = jnp.pad(w2t, ((0, 0), (0, 0), (0, 2)))                          # (9, 10, 8)
    b2v = b2.reshape(10, 1).astype(f32)
    # fc1 weight re-indexed to the in-kernel layout: (c, q=h*12+w, n).
    # torch flatten order is (c, h, w); the 2 padded spatial lanes get weight 0.
    wl1p = jnp.pad(wl1.reshape(200, 10, 10, 10).astype(f32),
                   ((0, 0), (0, 0), (0, 2), (0, 2)))                      # (200,10,12,12)
    wl1p = wl1p.reshape(200, 10, _LANE_C2).transpose(1, 2, 0).astype(jnp.bfloat16)
    bl1v = bl1.reshape(1, 200).astype(f32)
    wl2m = wl2.T.astype(jnp.bfloat16)                                     # (200, 10)
    bl2v = bl2.reshape(1, 10).astype(f32)
    return w1m, b1v, w2t, b2v, wl1p, bl1v, wl2m, bl2v


def _prep_input(x):
    """(B,1,28,28) -> (B, 4 phases, 25 taps, 256 lanes); lane q = ii*12+jj."""
    B = x.shape[0]
    xb = x[:, 0].astype(jnp.float32)                     # (B, 28, 28)
    phases = []
    for pi in range(2):
        for pj in range(2):
            taps = []
            for di in range(5):
                for dj in range(5):
                    s, t = pi + di, pj + dj
                    sub = xb[:, s:s + 24:2, t:t + 24:2]  # (B, 12, 12)
                    taps.append(sub.reshape(B, _LANE_C2))
            phases.append(jnp.stack(taps, axis=1))       # (B, 25, 144)
    xph = jnp.stack(phases, axis=1)                      # (B, 4, 25, 144)
    return jnp.pad(xph, ((0, 0), (0, 0), (0, 0), (0, _LANE_POOL - _LANE_C2)))


def fpganet_forward(x, params):
    B = x.shape[0]
    w1m, b1v, w2t, b2v, wl1p, bl1v, wl2m, bl2v = _prep_params(params)
    xph = _prep_input(x)

    out = pl.pallas_call(
        _fpganet_kernel,
        out_shape=jax.ShapeDtypeStruct((B, 1, 10), jnp.float32),
        grid_spec=pltpu.PrefetchScalarGridSpec(
            num_scalar_prefetch=0,
            grid=(B,),
            in_specs=[
                pl.BlockSpec((1, 4, 25, _LANE_POOL), lambda b: (b, 0, 0, 0)),
                pl.BlockSpec((8, 25), lambda b: (0, 0)),
                pl.BlockSpec((8, 1), lambda b: (0, 0)),
                pl.BlockSpec((9, 10, 8), lambda b: (0, 0, 0)),
                pl.BlockSpec((10, 1), lambda b: (0, 0)),
                pl.BlockSpec((10, _LANE_C2, 200), lambda b: (0, 0, 0)),
                pl.BlockSpec((1, 200), lambda b: (0, 0)),
                pl.BlockSpec((200, 10), lambda b: (0, 0)),
                pl.BlockSpec((1, 10), lambda b: (0, 0)),
            ],
            out_specs=pl.BlockSpec((1, 1, 10), lambda b: (b, 0, 0)),
            scratch_shapes=[pltpu.VMEM((8, _LANE_POOL), jnp.float32)],
        ),
        compiler_params=pltpu.CompilerParams(
            dimension_semantics=("parallel",)),
    )(xph, w1m, b1v, w2t, b2v, wl1p, bl1v, wl2m, bl2v)
    return out.reshape(B, 10)


# ----------------------------------------------------------------------------
# Deterministic parameter init (mirrors the torch module's weight_init)
# ----------------------------------------------------------------------------
def init_params(key):
    k1, k2, k3, k4 = jax.random.split(key, 4)
    w1 = jax.random.normal(k1, (6, 1, 5, 5), jnp.float32) * np.sqrt(2.0 / (6 * 5 * 5))
    b1 = jnp.zeros((6,), jnp.float32)
    w2 = jax.random.normal(k2, (10, 6, 3, 3), jnp.float32) * np.sqrt(2.0 / (10 * 3 * 3))
    b2 = jnp.zeros((10,), jnp.float32)
    wl1 = jax.random.normal(k3, (200, 1000), jnp.float32) * 0.01
    bl1 = jnp.zeros((200,), jnp.float32)
    wl2 = jax.random.normal(k4, (10, 200), jnp.float32) * 0.01
    bl2 = jnp.zeros((10,), jnp.float32)
    return (w1, b1, w2, b2, wl1, bl1, wl2, bl2)


# ----------------------------------------------------------------------------
# Pure-JAX reference (correctness sanity check)
# ----------------------------------------------------------------------------
def reference_forward(x, params):
    w1, b1, w2, b2, wl1, bl1, wl2, bl2 = params
    dn = ("NCHW", "OIHW", "NCHW")
    y = jax.lax.conv_general_dilated(x, w1, (1, 1), "VALID", dimension_numbers=dn)
    y = jax.nn.relu(y + b1[None, :, None, None])
    y = jax.lax.reduce_window(y, -jnp.inf, jax.lax.max,
                              (1, 1, 2, 2), (1, 1, 2, 2), "VALID")
    y = jax.lax.conv_general_dilated(y, w2, (1, 1), "VALID", dimension_numbers=dn)
    y = jax.nn.relu(y + b2[None, :, None, None])
    y = y.reshape(y.shape[0], -1)
    y = jax.nn.relu(y @ wl1.T + bl1)
    y = y @ wl2.T + bl2
    return y


if __name__ == "__main__":
    key = jax.random.PRNGKey(0)
    kx, kp = jax.random.split(key)
    # Module geometry implies 28x28 single-channel input (MNIST-like).
    x = jax.random.normal(kx, (2, 1, 28, 28), jnp.float32)
    params = init_params(kp)

    fwd = jax.jit(fpganet_forward)
    out = jax.block_until_ready(fwd(x, params))
    assert out.shape == (2, 10), out.shape
    ref = jax.block_until_ready(reference_forward(x, params))
    np.testing.assert_allclose(np.asarray(out), np.asarray(ref),
                               rtol=5e-2, atol=5e-3)

    # Extra check with non-zero biases to exercise the bias plumbing.
    kb1, kb2, kb3, kb4 = jax.random.split(jax.random.PRNGKey(1), 4)
    w1, b1, w2, b2, wl1, bl1, wl2, bl2 = params
    params2 = (w1, 0.1 * jax.random.normal(kb1, b1.shape, jnp.float32),
               w2, 0.1 * jax.random.normal(kb2, b2.shape, jnp.float32),
               wl1, 0.1 * jax.random.normal(kb3, bl1.shape, jnp.float32),
               wl2, 0.1 * jax.random.normal(kb4, bl2.shape, jnp.float32))
    out2 = jax.block_until_ready(fwd(x, params2))
    ref2 = jax.block_until_ready(reference_forward(x, params2))
    np.testing.assert_allclose(np.asarray(out2), np.asarray(ref2),
                               rtol=5e-2, atol=5e-3)

    print("KERNEL_OK")
</pallas_src>

<mosaic_0001>
module attributes {stable_mosaic.version = 11 : i64} {
  func.func @_fpganet_kernel(%arg0: i32, %arg1: memref<1x4x25x256xf32, #tpu.memory_space<vmem>>, %arg2: memref<8x25xf32, #tpu.memory_space<vmem>>, %arg3: memref<8x1xf32, #tpu.memory_space<vmem>>, %arg4: memref<9x10x8xf32, #tpu.memory_space<vmem>>, %arg5: memref<10x1xf32, #tpu.memory_space<vmem>>, %arg6: memref<10x144x200xbf16, #tpu.memory_space<vmem>>, %arg7: memref<1x200xf32, #tpu.memory_space<vmem>>, %arg8: memref<200x10xbf16, #tpu.memory_space<vmem>>, %arg9: memref<1x10xf32, #tpu.memory_space<vmem>>, %arg10: memref<1x1x10xf32, #tpu.memory_space<vmem>>, %arg11: memref<8x256xf32, #tpu.memory_space<vmem>>) attributes {dimension_semantics = [#tpu.dimension_semantics<parallel>], iteration_bounds = array<i64: 2>, scalar_prefetch = 0 : i64, scratch_operands = 1 : i64, tpu.core_type = #tpu.core_type<tc>, window_params = [{transform_indices = @transform_0, window_bounds = array<i64: 1, 4, 25, 256>}, {pipeline_mode = #tpu.pipeline_mode<synchronous>, transform_indices = @transform_1, window_bounds = array<i64: 8, 25>}, {pipeline_mode = #tpu.pipeline_mode<synchronous>, transform_indices = @transform_2, window_bounds = array<i64: 8, 1>}, {pipeline_mode = #tpu.pipeline_mode<synchronous>, transform_indices = @transform_3, window_bounds = array<i64: 9, 10, 8>}, {pipeline_mode = #tpu.pipeline_mode<synchronous>, transform_indices = @transform_4, window_bounds = array<i64: 10, 1>}, {pipeline_mode = #tpu.pipeline_mode<synchronous>, transform_indices = @transform_5, window_bounds = array<i64: 10, 144, 200>}, {pipeline_mode = #tpu.pipeline_mode<synchronous>, transform_indices = @transform_6, window_bounds = array<i64: 1, 200>}, {pipeline_mode = #tpu.pipeline_mode<synchronous>, transform_indices = @transform_7, window_bounds = array<i64: 200, 10>}, {pipeline_mode = #tpu.pipeline_mode<synchronous>, transform_indices = @transform_8, window_bounds = array<i64: 1, 10>}, {transform_indices = @transform_9, window_bounds = array<i64: 1, 1, 10>}]} {
    %c0 = arith.constant 0 : index
    %c0_0 = arith.constant 0 : index
    %0 = vector.load %arg2[%c0, %c0_0] : memref<8x25xf32, #tpu.memory_space<vmem>>, vector<8x25xf32>
    %c0_1 = arith.constant 0 : index
    %c0_2 = arith.constant 0 : index
    %1 = vector.load %arg3[%c0_1, %c0_2] : memref<8x1xf32, #tpu.memory_space<vmem>>, vector<8x1xf32>
    %c0_3 = arith.constant 0 : index
    %c0_4 = arith.constant 0 : index
    %c0_5 = arith.constant 0 : index
    %c0_6 = arith.constant 0 : index
    %2 = vector.load %arg1[%c0_3, %c0_4, %c0_5, %c0_6] : memref<1x4x25x256xf32, #tpu.memory_space<vmem>>, vector<1x1x25x256xf32>
    %3 = vector.shape_cast %2 : vector<1x1x25x256xf32> to vector<25x256xf32>
    %cst = arith.constant dense<0.000000e+00> : vector<8x256xf32>
    %4 = tpu.matmul %0, %3, %cst {dimension_numbers = #tpu.dot_dimension_numbers<[1], [0], [0], [1], [0, 0, 1, 1], [], []>} : vector<8x25xf32>, vector<25x256xf32>, vector<8x256xf32> -> vector<8x256xf32>
    %5 = vector.broadcast %1 : vector<8x1xf32> to vector<8x256xf32>
    %6 = arith.addf %4, %5 : vector<8x256xf32>
    %cst_7 = arith.constant 0.000000e+00 : f32
    %7 = vector.broadcast %cst_7 : f32 to vector<8x256xf32>
    %8 = arith.maximumf %6, %7 : vector<8x256xf32>
    %c0_8 = arith.constant 0 : index
    %c1 = arith.constant 1 : index
    %c0_9 = arith.constant 0 : index
    %c0_10 = arith.constant 0 : index
    %9 = vector.load %arg1[%c0_8, %c1, %c0_9, %c0_10] : memref<1x4x25x256xf32, #tpu.memory_space<vmem>>, vector<1x1x25x256xf32>
    %10 = vector.shape_cast %9 : vector<1x1x25x256xf32> to vector<25x256xf32>
    %cst_11 = arith.constant dense<0.000000e+00> : vector<8x256xf32>
    %11 = tpu.matmul %0, %10, %cst_11 {dimension_numbers = #tpu.dot_dimension_numbers<[1], [0], [0], [1], [0, 0, 1, 1], [], []>} : vector<8x25xf32>, vector<25x256xf32>, vector<8x256xf32> -> vector<8x256xf32>
    %12 = vector.broadcast %1 : vector<8x1xf32> to vector<8x256xf32>
    %13 = arith.addf %11, %12 : vector<8x256xf32>
    %cst_12 = arith.constant 0.000000e+00 : f32
    %14 = vector.broadcast %cst_12 : f32 to vector<8x256xf32>
    %15 = arith.maximumf %13, %14 : vector<8x256xf32>
    %16 = arith.maximumf %8, %15 : vector<8x256xf32>
    %c0_13 = arith.constant 0 : index
    %c2 = arith.constant 2 : index
    %c0_14 = arith.constant 0 : index
    %c0_15 = arith.constant 0 : index
    %17 = vector.load %arg1[%c0_13, %c2, %c0_14, %c0_15] : memref<1x4x25x256xf32, #tpu.memory_space<vmem>>, vector<1x1x25x256xf32>
    %18 = vector.shape_cast %17 : vector<1x1x25x256xf32> to vector<25x256xf32>
    %cst_16 = arith.constant dense<0.000000e+00> : vector<8x256xf32>
    %19 = tpu.matmul %0, %18, %cst_16 {dimension_numbers = #tpu.dot_dimension_numbers<[1], [0], [0], [1], [0, 0, 1, 1], [], []>} : vector<8x25xf32>, vector<25x256xf32>, vector<8x256xf32> -> vector<8x256xf32>
    %20 = vector.broadcast %1 : vector<8x1xf32> to vector<8x256xf32>
    %21 = arith.addf %19, %20 : vector<8x256xf32>
    %cst_17 = arith.constant 0.000000e+00 : f32
    %22 = vector.broadcast %cst_17 : f32 to vector<8x256xf32>
    %23 = arith.maximumf %21, %22 : vector<8x256xf32>
    %24 = arith.maximumf %16, %23 : vector<8x256xf32>
    %c0_18 = arith.constant 0 : index
    %c3 = arith.constant 3 : index
    %c0_19 = arith.constant 0 : index
    %c0_20 = arith.constant 0 : index
    %25 = vector.load %arg1[%c0_18, %c3, %c0_19, %c0_20] : memref<1x4x25x256xf32, #tpu.memory_space<vmem>>, vector<1x1x25x256xf32>
    %26 = vector.shape_cast %25 : vector<1x1x25x256xf32> to vector<25x256xf32>
    %cst_21 = arith.constant dense<0.000000e+00> : vector<8x256xf32>
    %27 = tpu.matmul %0, %26, %cst_21 {dimension_numbers = #tpu.dot_dimension_numbers<[1], [0], [0], [1], [0, 0, 1, 1], [], []>} : vector<8x25xf32>, vector<25x256xf32>, vector<8x256xf32> -> vector<8x256xf32>
    %28 = vector.broadcast %1 : vector<8x1xf32> to vector<8x256xf32>
    %29 = arith.addf %27, %28 : vector<8x256xf32>
    %cst_22 = arith.constant 0.000000e+00 : f32
    %30 = vector.broadcast %cst_22 : f32 to vector<8x256xf32>
    %31 = arith.maximumf %29, %30 : vector<8x256xf32>
    %32 = arith.maximumf %24, %31 : vector<8x256xf32>
    %c0_23 = arith.constant 0 : index
    %c0_24 = arith.constant 0 : index
    %33 = vector.load %arg11[%c0_23, %c0_24] : memref<8x256xf32, #tpu.memory_space<vmem>>, vector<8x256xf32>
    tpu.vector_store %arg11[%c0_23, %c0_24], %32 {strides = array<i32>} : memref<8x256xf32, #tpu.memory_space<vmem>>, vector<8x256xf32>,
    %cst_25 = arith.constant 0.000000e+00 : f32
    %34 = vector.broadcast %cst_25 : f32 to vector<10x144xf32>
    %c0_26 = arith.constant 0 : index
    %c0_27 = arith.constant 0 : index
    %35 = vector.load %arg11[%c0_26, %c0_27] : memref<8x256xf32, #tpu.memory_space<vmem>>, vector<8x144xf32>
    %c0_28 = arith.constant 0 : index
    %c0_29 = arith.constant 0 : index
    %c0_30 = arith.constant 0 : index
    %36 = vector.load %arg4[%c0_28, %c0_29, %c0_30] : memref<9x10x8xf32, #tpu.memory_space<vmem>>, vector<1x10x8xf32>
    %37 = vector.shape_cast %36 : vector<1x10x8xf32> to vector<10x8xf32>
    %cst_31 = arith.constant dense<0.000000e+00> : vector<10x144xf32>
    %38 = tpu.matmul %37, %35, %cst_31 {dimension_numbers = #tpu.dot_dimension_numbers<[1], [0], [0], [1], [0, 0, 1, 1], [], []>} : vector<10x8xf32>, vector<8x144xf32>, vector<10x144xf32> -> vector<10x144xf32>
    %39 = arith.addf %34, %38 : vector<10x144xf32>
    %c0_32 = arith.constant 0 : index
    %c1_33 = arith.constant 1 : index
    %40 = vector.load %arg11[%c0_32, %c1_33] : memref<8x256xf32, #tpu.memory_space<vmem>>, vector<8x144xf32>
    %c1_34 = arith.constant 1 : index
    %c0_35 = arith.constant 0 : index
    %c0_36 = arith.constant 0 : index
    %41 = vector.load %arg4[%c1_34, %c0_35, %c0_36] : memref<9x10x8xf32, #tpu.memory_space<vmem>>, vector<1x10x8xf32>
    %42 = vector.shape_cast %41 : vector<1x10x8xf32> to vector<10x8xf32>
    %cst_37 = arith.constant dense<0.000000e+00> : vector<10x144xf32>
    %43 = tpu.matmul %42, %40, %cst_37 {dimension_numbers = #tpu.dot_dimension_numbers<[1], [0], [0], [1], [0, 0, 1, 1], [], []>} : vector<10x8xf32>, vector<8x144xf32>, vector<10x144xf32> -> vector<10x144xf32>
    %44 = arith.addf %39, %43 : vector<10x144xf32>
    %c0_38 = arith.constant 0 : index
    %c2_39 = arith.constant 2 : index
    %45 = vector.load %arg11[%c0_38, %c2_39] : memref<8x256xf32, #tpu.memory_space<vmem>>, vector<8x144xf32>
    %c2_40 = arith.constant 2 : index
    %c0_41 = arith.constant 0 : index
    %c0_42 = arith.constant 0 : index
    %46 = vector.load %arg4[%c2_40, %c0_41, %c0_42] : memref<9x10x8xf32, #tpu.memory_space<vmem>>, vector<1x10x8xf32>
    %47 = vector.shape_cast %46 : vector<1x10x8xf32> to vector<10x8xf32>
    %cst_43 = arith.constant dense<0.000000e+00> : vector<10x144xf32>
    %48 = tpu.matmul %47, %45, %cst_43 {dimension_numbers = #tpu.dot_dimension_numbers<[1], [0], [0], [1], [0, 0, 1, 1], [], []>} : vector<10x8xf32>, vector<8x144xf32>, vector<10x144xf32> -> vector<10x144xf32>
    %49 = arith.addf %44, %48 : vector<10x144xf32>
    %c0_44 = arith.constant 0 : index
    %c12 = arith.constant 12 : index
    %50 = vector.load %arg11[%c0_44, %c12] : memref<8x256xf32, #tpu.memory_space<vmem>>, vector<8x144xf32>
    %c3_45 = arith.constant 3 : index
    %c0_46 = arith.constant 0 : index
    %c0_47 = arith.constant 0 : index
    %51 = vector.load %arg4[%c3_45, %c0_46, %c0_47] : memref<9x10x8xf32, #tpu.memory_space<vmem>>, vector<1x10x8xf32>
    %52 = vector.shape_cast %51 : vector<1x10x8xf32> to vector<10x8xf32>
    %cst_48 = arith.constant dense<0.000000e+00> : vector<10x144xf32>
    %53 = tpu.matmul %52, %50, %cst_48 {dimension_numbers = #tpu.dot_dimension_numbers<[1], [0], [0], [1], [0, 0, 1, 1], [], []>} : vector<10x8xf32>, vector<8x144xf32>, vector<10x144xf32> -> vector<10x144xf32>
    %54 = arith.addf %49, %53 : vector<10x144xf32>
    %c0_49 = arith.constant 0 : index
    %c13 = arith.constant 13 : index
    %55 = vector.load %arg11[%c0_49, %c13] : memref<8x256xf32, #tpu.memory_space<vmem>>, vector<8x144xf32>
    %c4 = arith.constant 4 : index
    %c0_50 = arith.constant 0 : index
    %c0_51 = arith.constant 0 : index
    %56 = vector.load %arg4[%c4, %c0_50, %c0_51] : memref<9x10x8xf32, #tpu.memory_space<vmem>>, vector<1x10x8xf32>
    %57 = vector.shape_cast %56 : vector<1x10x8xf32> to vector<10x8xf32>
    %cst_52 = arith.constant dense<0.000000e+00> : vector<10x144xf32>
    %58 = tpu.matmul %57, %55, %cst_52 {dimension_numbers = #tpu.dot_dimension_numbers<[1], [0], [0], [1], [0, 0, 1, 1], [], []>} : vector<10x8xf32>, vector<8x144xf32>, vector<10x144xf32> -> vector<10x144xf32>
    %59 = arith.addf %54, %58 : vector<10x144xf32>
    %c0_53 = arith.constant 0 : index
    %c14 = arith.constant 14 : index
    %60 = vector.load %arg11[%c0_53, %c14] : memref<8x256xf32, #tpu.memory_space<vmem>>, vector<8x144xf32>
    %c5 = arith.constant 5 : index
    %c0_54 = arith.constant 0 : index
    %c0_55 = arith.constant 0 : index
    %61 = vector.load %arg4[%c5, %c0_54, %c0_55] : memref<9x10x8xf32, #tpu.memory_space<vmem>>, vector<1x10x8xf32>
    %62 = vector.shape_cast %61 : vector<1x10x8xf32> to vector<10x8xf32>
    %cst_56 = arith.constant dense<0.000000e+00> : vector<10x144xf32>
    %63 = tpu.matmul %62, %60, %cst_56 {dimension_numbers = #tpu.dot_dimension_numbers<[1], [0], [0], [1], [0, 0, 1, 1], [], []>} : vector<10x8xf32>, vector<8x144xf32>, vector<10x144xf32> -> vector<10x144xf32>
    %64 = arith.addf %59, %63 : vector<10x144xf32>
    %c0_57 = arith.constant 0 : index
    %c24 = arith.constant 24 : index
    %65 = vector.load %arg11[%c0_57, %c24] : memref<8x256xf32, #tpu.memory_space<vmem>>, vector<8x144xf32>
    %c6 = arith.constant 6 : index
    %c0_58 = arith.constant 0 : index
    %c0_59 = arith.constant 0 : index
    %66 = vector.load %arg4[%c6, %c0_58, %c0_59] : memref<9x10x8xf32, #tpu.memory_space<vmem>>, vector<1x10x8xf32>
    %67 = vector.shape_cast %66 : vector<1x10x8xf32> to vector<10x8xf32>
    %cst_60 = arith.constant dense<0.000000e+00> : vector<10x144xf32>
    %68 = tpu.matmul %67, %65, %cst_60 {dimension_numbers = #tpu.dot_dimension_numbers<[1], [0], [0], [1], [0, 0, 1, 1], [], []>} : vector<10x8xf32>, vector<8x144xf32>, vector<10x144xf32> -> vector<10x144xf32>
    %69 = arith.addf %64, %68 : vector<10x144xf32>
    %c0_61 = arith.constant 0 : index
    %c25 = arith.constant 25 : index
    %70 = vector.load %arg11[%c0_61, %c25] : memref<8x256xf32, #tpu.memory_space<vmem>>, vector<8x144xf32>
    %c7 = arith.constant 7 : index
    %c0_62 = arith.constant 0 : index
    %c0_63 = arith.constant 0 : index
    %71 = vector.load %arg4[%c7, %c0_62, %c0_63] : memref<9x10x8xf32, #tpu.memory_space<vmem>>, vector<1x10x8xf32>
    %72 = vector.shape_cast %71 : vector<1x10x8xf32> to vector<10x8xf32>
    %cst_64 = arith.constant dense<0.000000e+00> : vector<10x144xf32>
    %73 = tpu.matmul %72, %70, %cst_64 {dimension_numbers = #tpu.dot_dimension_numbers<[1], [0], [0], [1], [0, 0, 1, 1], [], []>} : vector<10x8xf32>, vector<8x144xf32>, vector<10x144xf32> -> vector<10x144xf32>
    %74 = arith.addf %69, %73 : vector<10x144xf32>
    %c0_65 = arith.constant 0 : index
    %c26 = arith.constant 26 : index
    %75 = vector.load %arg11[%c0_65, %c26] : memref<8x256xf32, #tpu.memory_space<vmem>>, vector<8x144xf32>
    %c8 = arith.constant 8 : index
    %c0_66 = arith.constant 0 : index
    %c0_67 = arith.constant 0 : index
    %76 = vector.load %arg4[%c8, %c0_66, %c0_67] : memref<9x10x8xf32, #tpu.memory_space<vmem>>, vector<1x10x8xf32>
    %77 = vector.shape_cast %76 : vector<1x10x8xf32> to vector<10x8xf32>
    %cst_68 = arith.constant dense<0.000000e+00> : vector<10x144xf32>
    %78 = tpu.matmul %77, %75, %cst_68 {dimension_numbers = #tpu.dot_dimension_numbers<[1], [0], [0], [1], [0, 0, 1, 1], [], []>} : vector<10x8xf32>, vector<8x144xf32>, vector<10x144xf32> -> vector<10x144xf32>
    %79 = arith.addf %74, %78 : vector<10x144xf32>
    %c0_69 = arith.constant 0 : index
    %c0_70 = arith.constant 0 : index
    %80 = vector.load %arg5[%c0_69, %c0_70] : memref<10x1xf32, #tpu.memory_space<vmem>>, vector<10x1xf32>
    %81 = vector.broadcast %80 : vector<10x1xf32> to vector<10x144xf32>
    %82 = arith.addf %79, %81 : vector<10x144xf32>
    %cst_71 = arith.constant 0.000000e+00 : f32
    %83 = vector.broadcast %cst_71 : f32 to vector<10x144xf32>
    %84 = arith.maximumf %82, %83 : vector<10x144xf32>
    %cst_72 = arith.constant 0.000000e+00 : f32
    %85 = vector.broadcast %cst_72 : f32 to vector<1x200xf32>
    %86 = vector.extract_strided_slice %84 {offsets = [0, 0], sizes = [1, 144], strides = [1, 1]} : vector<10x144xf32> to vector<1x144xf32>
    %87 = arith.truncf %86 : vector<1x144xf32> to vector<1x144xbf16>
    %c0_73 = arith.constant 0 : index
    %c0_74 = arith.constant 0 : index
    %c0_75 = arith.constant 0 : index
    %88 = vector.load %arg6[%c0_73, %c0_74, %c0_75] : memref<10x144x200xbf16, #tpu.memory_space<vmem>>, vector<1x144x200xbf16>
    %89 = vector.shape_cast %88 : vector<1x144x200xbf16> to vector<144x200xbf16>
    %cst_76 = arith.constant dense<0.000000e+00> : vector<1x200xf32>
    %90 = tpu.matmul %87, %89, %cst_76 {dimension_numbers = #tpu.dot_dimension_numbers<[1], [0], [0], [1], [0, 0, 1, 1], [], []>} : vector<1x144xbf16>, vector<144x200xbf16>, vector<1x200xf32> -> vector<1x200xf32>
    %91 = arith.addf %85, %90 : vector<1x200xf32>
    %92 = vector.extract_strided_slice %84 {offsets = [1, 0], sizes = [1, 144], strides = [1, 1]} : vector<10x144xf32> to vector<1x144xf32>
    %93 = arith.truncf %92 : vector<1x144xf32> to vector<1x144xbf16>
    %c1_77 = arith.constant 1 : index
    %c0_78 = arith.constant 0 : index
    %c0_79 = arith.constant 0 : index
    %94 = vector.load %arg6[%c1_77, %c0_78, %c0_79] : memref<10x144x200xbf16, #tpu.memory_space<vmem>>, vector<1x144x200xbf16>
    %95 = vector.shape_cast %94 : vector<1x144x200xbf16> to vector<144x200xbf16>
    %cst_80 = arith.constant dense<0.000000e+00> : vector<1x200xf32>
    %96 = tpu.matmul %93, %95, %cst_80 {dimension_numbers = #tpu.dot_dimension_numbers<[1], [0], [0], [1], [0, 0, 1, 1], [], []>} : vector<1x144xbf16>, vector<144x200xbf16>, vector<1x200xf32> -> vector<1x200xf32>
    %97 = arith.addf %91, %96 : vector<1x200xf32>
    %98 = vector.extract_strided_slice %84 {offsets = [2, 0], sizes = [1, 144], strides = [1, 1]} : vector<10x144xf32> to vector<1x144xf32>
    %99 = arith.truncf %98 : vector<1x144xf32> to vector<1x144xbf16>
    %c2_81 = arith.constant 2 : index
    %c0_82 = arith.constant 0 : index
    %c0_83 = arith.constant 0 : index
    %100 = vector.load %arg6[%c2_81, %c0_82, %c0_83] : memref<10x144x200xbf16, #tpu.memory_space<vmem>>, vector<1x144x200xbf16>
    %101 = vector.shape_cast %100 : vector<1x144x200xbf16> to vector<144x200xbf16>
    %cst_84 = arith.constant dense<0.000000e+00> : vector<1x200xf32>
    %102 = tpu.matmul %99, %101, %cst_84 {dimension_numbers = #tpu.dot_dimension_numbers<[1], [0], [0], [1], [0, 0, 1, 1], [], []>} : vector<1x144xbf16>, vector<144x200xbf16>, vector<1x200xf32> -> vector<1x200xf32>
    %103 = arith.addf %97, %102 : vector<1x200xf32>
    %104 = vector.extract_strided_slice %84 {offsets = [3, 0], sizes = [1, 144], strides = [1, 1]} : vector<10x144xf32> to vector<1x144xf32>
    %105 = arith.truncf %104 : vector<1x144xf32> to vector<1x144xbf16>
    %c3_85 = arith.constant 3 : index
    %c0_86 = arith.constant 0 : index
    %c0_87 = arith.constant 0 : index
    %106 = vector.load %arg6[%c3_85, %c0_86, %c0_87] : memref<10x144x200xbf16, #tpu.memory_space<vmem>>, vector<1x144x200xbf16>
    %107 = vector.shape_cast %106 : vector<1x144x200xbf16> to vector<144x200xbf16>
    %cst_88 = arith.constant dense<0.000000e+00> : vector<1x200xf32>
    %108 = tpu.matmul %105, %107, %cst_88 {dimension_numbers = #tpu.dot_dimension_numbers<[1], [0], [0], [1], [0, 0, 1, 1], [], []>} : vector<1x144xbf16>, vector<144x200xbf16>, vector<1x200xf32> -> vector<1x200xf32>
    %109 = arith.addf %103, %108 : vector<1x200xf32>
    %110 = vector.extract_strided_slice %84 {offsets = [4, 0], sizes = [1, 144], strides = [1, 1]} : vector<10x144xf32> to vector<1x144xf32>
    %111 = arith.truncf %110 : vector<1x144xf32> to vector<1x144xbf16>
    %c4_89 = arith.constant 4 : index
    %c0_90 = arith.constant 0 : index
    %c0_91 = arith.constant 0 : index
    %112 = vector.load %arg6[%c4_89, %c0_90, %c0_91] : memref<10x144x200xbf16, #tpu.memory_space<vmem>>, vector<1x144x200xbf16>
    %113 = vector.shape_cast %112 : vector<1x144x200xbf16> to vector<144x200xbf16>
    %cst_92 = arith.constant dense<0.000000e+00> : vector<1x200xf32>
    %114 = tpu.matmul %111, %113, %cst_92 {dimension_numbers = #tpu.dot_dimension_numbers<[1], [0], [0], [1], [0, 0, 1, 1], [], []>} : vector<1x144xbf16>, vector<144x200xbf16>, vector<1x200xf32> -> vector<1x200xf32>
    %115 = arith.addf %109, %114 : vector<1x200xf32>
    %116 = vector.extract_strided_slice %84 {offsets = [5, 0], sizes = [1, 144], strides = [1, 1]} : vector<10x144xf32> to vector<1x144xf32>
    %117 = arith.truncf %116 : vector<1x144xf32> to vector<1x144xbf16>
    %c5_93 = arith.constant 5 : index
    %c0_94 = arith.constant 0 : index
    %c0_95 = arith.constant 0 : index
    %118 = vector.load %arg6[%c5_93, %c0_94, %c0_95] : memref<10x144x200xbf16, #tpu.memory_space<vmem>>, vector<1x144x200xbf16>
    %119 = vector.shape_cast %118 : vector<1x144x200xbf16> to vector<144x200xbf16>
    %cst_96 = arith.constant dense<0.000000e+00> : vector<1x200xf32>
    %120 = tpu.matmul %117, %119, %cst_96 {dimension_numbers = #tpu.dot_dimension_numbers<[1], [0], [0], [1], [0, 0, 1, 1], [], []>} : vector<1x144xbf16>, vector<144x200xbf16>, vector<1x200xf32> -> vector<1x200xf32>
    %121 = arith.addf %115, %120 : vector<1x200xf32>
    %122 = vector.extract_strided_slice %84 {offsets = [6, 0], sizes = [1, 144], strides = [1, 1]} : vector<10x144xf32> to vector<1x144xf32>
    %123 = arith.truncf %122 : vector<1x144xf32> to vector<1x144xbf16>
    %c6_97 = arith.constant 6 : index
    %c0_98 = arith.constant 0 : index
    %c0_99 = arith.constant 0 : index
    %124 = vector.load %arg6[%c6_97, %c0_98, %c0_99] : memref<10x144x200xbf16, #tpu.memory_space<vmem>>, vector<1x144x200xbf16>
    %125 = vector.shape_cast %124 : vector<1x144x200xbf16> to vector<144x200xbf16>
    %cst_100 = arith.constant dense<0.000000e+00> : vector<1x200xf32>
    %126 = tpu.matmul %123, %125, %cst_100 {dimension_numbers = #tpu.dot_dimension_numbers<[1], [0], [0], [1], [0, 0, 1, 1], [], []>} : vector<1x144xbf16>, vector<144x200xbf16>, vector<1x200xf32> -> vector<1x200xf32>
    %127 = arith.addf %121, %126 : vector<1x200xf32>
    %128 = vector.extract_strided_slice %84 {offsets = [7, 0], sizes = [1, 144], strides = [1, 1]} : vector<10x144xf32> to vector<1x144xf32>
    %129 = arith.truncf %128 : vector<1x144xf32> to vector<1x144xbf16>
    %c7_101 = arith.constant 7 : index
    %c0_102 = arith.constant 0 : index
    %c0_103 = arith.constant 0 : index
    %130 = vector.load %arg6[%c7_101, %c0_102, %c0_103] : memref<10x144x200xbf16, #tpu.memory_space<vmem>>, vector<1x144x200xbf16>
    %131 = vector.shape_cast %130 : vector<1x144x200xbf16> to vector<144x200xbf16>
    %cst_104 = arith.constant dense<0.000000e+00> : vector<1x200xf32>
    %132 = tpu.matmul %129, %131, %cst_104 {dimension_numbers = #tpu.dot_dimension_numbers<[1], [0], [0], [1], [0, 0, 1, 1], [], []>} : vector<1x144xbf16>, vector<144x200xbf16>, vector<1x200xf32> -> vector<1x200xf32>
    %133 = arith.addf %127, %132 : vector<1x200xf32>
    %134 = vector.extract_strided_slice %84 {offsets = [8, 0], sizes = [1, 144], strides = [1, 1]} : vector<10x144xf32> to vector<1x144xf32>
    %135 = arith.truncf %134 : vector<1x144xf32> to vector<1x144xbf16>
    %c8_105 = arith.constant 8 : index
    %c0_106 = arith.constant 0 : index
    %c0_107 = arith.constant 0 : index
    %136 = vector.load %arg6[%c8_105, %c0_106, %c0_107] : memref<10x144x200xbf16, #tpu.memory_space<vmem>>, vector<1x144x200xbf16>
    %137 = vector.shape_cast %136 : vector<1x144x200xbf16> to vector<144x200xbf16>
    %cst_108 = arith.constant dense<0.000000e+00> : vector<1x200xf32>
    %138 = tpu.matmul %135, %137, %cst_108 {dimension_numbers = #tpu.dot_dimension_numbers<[1], [0], [0], [1], [0, 0, 1, 1], [], []>} : vector<1x144xbf16>, vector<144x200xbf16>, vector<1x200xf32> -> vector<1x200xf32>
    %139 = arith.addf %133, %138 : vector<1x200xf32>
    %140 = vector.extract_strided_slice %84 {offsets = [9, 0], sizes = [1, 144], strides = [1, 1]} : vector<10x144xf32> to vector<1x144xf32>
    %141 = arith.truncf %140 : vector<1x144xf32> to vector<1x144xbf16>
    %c9 = arith.constant 9 : index
    %c0_109 = arith.constant 0 : index
    %c0_110 = arith.constant 0 : index
    %142 = vector.load %arg6[%c9, %c0_109, %c0_110] : memref<10x144x200xbf16, #tpu.memory_space<vmem>>, vector<1x144x200xbf16>
    %143 = vector.shape_cast %142 : vector<1x144x200xbf16> to vector<144x200xbf16>
    %cst_111 = arith.constant dense<0.000000e+00> : vector<1x200xf32>
    %144 = tpu.matmul %141, %143, %cst_111 {dimension_numbers = #tpu.dot_dimension_numbers<[1], [0], [0], [1], [0, 0, 1, 1], [], []>} : vector<1x144xbf16>, vector<144x200xbf16>, vector<1x200xf32> -> vector<1x200xf32>
    %145 = arith.addf %139, %144 : vector<1x200xf32>
    %c0_112 = arith.constant 0 : index
    %c0_113 = arith.constant 0 : index
    %146 = vector.load %arg7[%c0_112, %c0_113] : memref<1x200xf32, #tpu.memory_space<vmem>>, vector<1x200xf32>
    %147 = arith.addf %145, %146 : vector<1x200xf32>
    %cst_114 = arith.constant 0.000000e+00 : f32
    %148 = vector.broadcast %cst_114 : f32 to vector<1x200xf32>
    %149 = arith.maximumf %147, %148 : vector<1x200xf32>
    %150 = arith.truncf %149 : vector<1x200xf32> to vector<1x200xbf16>
    %c0_115 = arith.constant 0 : index
    %c0_116 = arith.constant 0 : index
    %151 = vector.load %arg8[%c0_115, %c0_116] : memref<200x10xbf16, #tpu.memory_space<vmem>>, vector<200x10xbf16>
    %cst_117 = arith.constant dense<0.000000e+00> : vector<1x10xf32>
    %152 = tpu.matmul %150, %151, %cst_117 {dimension_numbers = #tpu.dot_dimension_numbers<[1], [0], [0], [1], [0, 0, 1, 1], [], []>} : vector<1x200xbf16>, vector<200x10xbf16>, vector<1x10xf32> -> vector<1x10xf32>
    %c0_118 = arith.constant 0 : index
    %c0_119 = arith.constant 0 : index
    %153 = vector.load %arg9[%c0_118, %c0_119] : memref<1x10xf32, #tpu.memory_space<vmem>>, vector<1x10xf32>
    %154 = arith.addf %152, %153 : vector<1x10xf32>
    %c0_120 = arith.constant 0 : index
    %c0_121 = arith.constant 0 : index
    %c0_122 = arith.constant 0 : index
    %155 = vector.load %arg10[%c0_120, %c0_121, %c0_122] : memref<1x1x10xf32, #tpu.memory_space<vmem>>, vector<1x1x10xf32>
    %156 = vector.shape_cast %155 : vector<1x1x10xf32> to vector<1x10xf32>
    %157 = vector.shape_cast %154 : vector<1x10xf32> to vector<1x1x10xf32>
    tpu.vector_store %arg10[%c0_120, %c0_121, %c0_122], %157 {strides = array<i32>} : memref<1x1x10xf32, #tpu.memory_space<vmem>>, vector<1x1x10xf32>,
    return
  }
  func.func @transform_0(%arg0: i32) -> (i32, i32, i32, i32) {
    %c0_i32 = arith.constant 0 : i32
    %c0_i32_0 = arith.constant 0 : i32
    %c0_i32_1 = arith.constant 0 : i32
    %c0_i32_2 = arith.constant 0 : i32
    return %arg0, %c0_i32, %c0_i32_0, %c0_i32_1 : i32, i32, i32, i32
  }
  func.func @transform_1(%arg0: i32) -> (i32, i32) {
    %c0_i32 = arith.constant 0 : i32
    %c0_i32_0 = arith.constant 0 : i32
    %c0_i32_1 = arith.constant 0 : i32
    return %c0_i32, %c0_i32_0 : i32, i32
  }
  func.func @transform_2(%arg0: i32) -> (i32, i32) {
    %c0_i32 = arith.constant 0 : i32
    %c0_i32_0 = arith.constant 0 : i32
    %c0_i32_1 = arith.constant 0 : i32
    return %c0_i32, %c0_i32_0 : i32, i32
  }
  func.func @transform_3(%arg0: i32) -> (i32, i32, i32) {
    %c0_i32 = arith.constant 0 : i32
    %c0_i32_0 = arith.constant 0 : i32
    %c0_i32_1 = arith.constant 0 : i32
    %c0_i32_2 = arith.constant 0 : i32
    return %c0_i32, %c0_i32_0, %c0_i32_1 : i32, i32, i32
  }
  func.func @transform_4(%arg0: i32) -> (i32, i32) {
    %c0_i32 = arith.constant 0 : i32
    %c0_i32_0 = arith.constant 0 : i32
    %c0_i32_1 = arith.constant 0 : i32
    return %c0_i32, %c0_i32_0 : i32, i32
  }
  func.func @transform_5(%arg0: i32) -> (i32, i32, i32) {
    %c0_i32 = arith.constant 0 : i32
    %c0_i32_0 = arith.constant 0 : i32
    %c0_i32_1 = arith.constant 0 : i32
    %c0_i32_2 = arith.constant 0 : i32
    return %c0_i32, %c0_i32_0, %c0_i32_1 : i32, i32, i32
  }
  func.func @transform_6(%arg0: i32) -> (i32, i32) {
    %c0_i32 = arith.constant 0 : i32
    %c0_i32_0 = arith.constant 0 : i32
    %c0_i32_1 = arith.constant 0 : i32
    return %c0_i32, %c0_i32_0 : i32, i32
  }
  func.func @transform_7(%arg0: i32) -> (i32, i32) {
    %c0_i32 = arith.constant 0 : i32
    %c0_i32_0 = arith.constant 0 : i32
    %c0_i32_1 = arith.constant 0 : i32
    return %c0_i32, %c0_i32_0 : i32, i32
  }
  func.func @transform_8(%arg0: i32) -> (i32, i32) {
    %c0_i32 = arith.constant 0 : i32
    %c0_i32_0 = arith.constant 0 : i32
    %c0_i32_1 = arith.constant 0 : i32
    return %c0_i32, %c0_i32_0 : i32, i32
  }
  func.func @transform_9(%arg0: i32) -> (i32, i32, i32) {
    %c0_i32 = arith.constant 0 : i32
    %c0_i32_0 = arith.constant 0 : i32
    %c0_i32_1 = arith.constant 0 : i32
    return %arg0, %c0_i32, %c0_i32_0 : i32, i32, i32
  }
}

</mosaic_0001>

<bundles_post_ra>
// kernel: fpganet_forward.1
= control target key start
LH: loop header
LB: loop body
LE: loop exit
PB: predicated region body
PF: predicated region fallthrough
CT: control target
= control target key end

     0   :  { %14 = vsyncpa [#allocation4], 0  ;;  %s5342_s0 = inlined_call_operand.vmem [shape: f32[2,4,25,256], index: 0, kind: input, shape index: {}]   ;;  %s5343_s1 = inlined_call_operand.vmem [shape: f32[8,25], index: 1, kind: input, shape index: {}]   ;;  %s5344_s2 = inlined_call_operand.vmem [shape: f32[8,1], index: 2, kind: input, shape index: {}]   ;;  %s5345_s3 = inlined_call_operand.vmem [shape: f32[9,10,8], index: 3, kind: input, shape index: {}]   ;;  %s5346_s4 = inlined_call_operand.vmem [shape: f32[10,1], index: 4, kind: input, shape index: {}]   ;;  %s5347_s5 = inlined_call_operand.vmem [shape: bf16[10,144,200], index: 5, kind: input, shape index: {}]   ;;  %s5348_s6 = inlined_call_operand.vmem [shape: f32[1,200], index: 6, kind: input, shape index: {}]   ;;  %s5349_s7 = inlined_call_operand.vmem [shape: bf16[200,10], index: 7, kind: input, shape index: {}]   ;;  %s5350_s8 = inlined_call_operand.vmem [shape: f32[1,10], index: 8, kind: input, shape index: {}]   ;;  %s5351_s9 = inlined_call_operand.hbm [shape: f32[2,1,10], index: 9, kind: output, shape index: {}]  }
   0x1   :  { %16 = vsyncpa [#allocation4 + $0x1], 0  ;;  %s4390_s30 = smov 0   ;;  %s4392_s10 = smov 0  }
   0x2   :  { %s4394_s11 = smov 0   ;;  %s4396_s12 = smov 0  }
   0x3 LB: > { %s4411_s13 = sadd.s32 4294967295, %s4326_s12   ;;  %s3411_s14 = sadd.s32 4294967294, %s4326_s12   ;;  %s4326_s12 = sphi %s4396_s12, %s5359_s12   ;;  %s4322_s11 = sphi %s4394_s11, %s5358_s11   ;;  %s4318_s10 = sphi %s4392_s10, %s5357_s10   ;;  %s4314_s30 = sphi %s4390_s30, %s5356_s30  }
   0x4   : > { %s4415_s15 = sadd.s32 1, %s4326_s12   ;;  %s223_s16 = sadd.s32 1, %s4322_s11 }
   0x5   : > { %s220_s17 = ssub.s32 %s4326_s12, %s4415_s15  ;;  %p233_p0 = scmp.ne.s32.totalorder %s4322_s11, %s4318_s10 }
   0x6   : > { %p221_p1 = scmp.eq.s32.totalorder %s220_s17, 0  ;;  %p234_p2 = scmp.eq.s32.totalorder %s4411_s13, 1 }
   0x7   : > { %p239_p3 = scmp.ne.s32.totalorder %s4318_s10, %s4314_s30  ;;  %p240_p4 = scmp.eq.s32.totalorder %s3411_s14, 1 }
   0x8   : > { %s4426_s18 = scalar_select %p221_p1, %s4322_s11, %s223_s16  }
   0x9   : > { %p4428_p5 = por %p234_p2, %p233_p0  ;;  %p4432_p6 = por %p240_p4, %p239_p3 }
   0xa   : > { %p3414_p7 = scmp.ge.s32.totalorder %s4326_s12, 1  ;;  %p290_p8 = scmp.lt.s32.totalorder %s4326_s12, 3 }
   0xc   : > { %p291_p9 = pnand %p3414_p7, %p290_p8 }
   0xd   : > { %p325_p10 = scmp.lt.s32.totalorder (!%p291_p9), %s4411_s13, 1  ;;  %vm350_vm0 = vcmask (!%p291_p9), 1040384   ;;  %vm4328_vm1 = vmmov (!%p291_p9), 1   ;;  %v4329_v1 = vmov (!%p291_p9), 0.0   ;;  %v332_v2 = vld [vmem:[%s5344_s2] sm:$0xff] (!%p291_p9)  ;;  %v4330_v3 = vmov (!%p291_p9), 0  }
   0xe   : > { %294 = sbr.rel (%p291_p9) target bundleno = 1342 (0x53e), region = 56  ;;  %vm4439_vm2 = vmpackc.low (!%p291_p9), %vm350_vm0, %vm4328_vm1  ;;  %421 = vmatprep.mubr.f32.mxu0 (!%p291_p9), %v4329_v1  ;;  %689 = vmatprep.mubr.f32.mxu1 (!%p291_p9), %v4329_v1  ;;  %v331_v28 = vld [vmem:[%s5343_s1] sm:$0xff] (!%p291_p9)  ;;  %vm346_vm3 = vcmask (!%p291_p9), 203776   ;;  %s4331_s14 = smov (!%p291_p9), 127   ;;  %vm715_vm4 = vcmask (!%p291_p9), 1039360   ;;  %vm719_vm5 = vcmask (!%p291_p9), 64512  }
   0xf   : > { %3979 = vset.pattern.permute.xlu0 (!%p291_p9), %v4330_v3  ;;  %3980 = vset.pattern.permute.xlu1 (!%p291_p9), %v4330_v3  ;;  %s4332_s16 = smov (!%p291_p9), 126   ;;  %s4333_s17 = smov (!%p291_p9), 116   ;;  %vm893_vm6 = vcmask (!%p291_p9), 1031168   ;;  %vm991_vm7 = vcmask (!%p291_p9), 949248   ;;  %vm1089_vm8 = vcmask (!%p291_p9), 941056   ;;  %vm1187_vm9 = vcmask (!%p291_p9), 932864  }
  0x10   : > { %343 = vperm.xlu0 (!%p291_p9), %3979, %v332_v2   ;;  %s4334_s21 = smov (!%p291_p9), 115   ;;  %s4335_s22 = smov (!%p291_p9), 114   ;;  %vm1285_vm10 = vcmask (!%p291_p9), 850944   ;;  %vm1383_vm11 = vcmask (!%p291_p9), 842752   ;;  %vm1481_vm12 = vcmask (!%p291_p9), 834560   ;;  %vm1728_vm13 = vcmask (!%p291_p9), 130048  }
  0x11   : > { %s4338_s25 = smov (!%p291_p9), 102   ;;  %vm3297_vm14 = vcmask (!%p291_p9), 1043456   ;;  %vm3293_vm15 = vcmask (!%p291_p9), 588800   ;;  %vm3341_vm0 = vcmask (!%p291_p9), 73728  }
  0x15   : > { %s326_s23 = scalar_select %p325_p10, %s4411_s13, 1 }
  0x17   : > { %s3856_s24 = sshll.u32 %s326_s23, 8  ;;  %s4336_s23 = smov 104  }
  0x18   : > { %s4454_s27 = scalar_lea.vmem %s5342_s0, %s3856_s24  ;;  %s4337_s24 = smov 103  }
  0x19   : > { %v334_v4 = vld [vmem:[%s4454_s27 + $0x8] sm:$0xff]  ;;  %v336_v5 = vld [vmem:[%s4454_s27 + $0x18] sm:$0xff]  ;;  %v333_v6 = vld [vmem:[%s4454_s27] sm:$0xff] }
  0x1a   : > { %v3857_v7 = vpack.c.bf16 %v336_v5, %v334_v4  ;;  %v335_v8 = vld [vmem:[%s4454_s27 + $0x10] sm:$0xff]  ;;  %v338_v9 = vld [vmem:[%s4454_s27 + $0x28] sm:$0xff]  ;;  %v340_v10 = vld [vmem:[%s4454_s27 + $0x38] sm:$0x1] }
  0x1b   : > { %v3859_v11 = vpack.c.bf16 %v335_v8, %v333_v6  ;;  %v3861_v12 = vpack.c.bf16 %v340_v10, %v338_v9  ;;  %v337_v13 = vld [vmem:[%s4454_s27 + $0x20] sm:$0xff]  ;;  %v339_v14 = vld [vmem:[%s4454_s27 + $0x30] sm:$0x1]  ;;  %v3421_v15 = vld [vmem:[%s4454_s27 + $0x48] sm:$0xff] }
  0x1c   : > { %3858 = vmatprep.subr.bf16.mxu0 %v3857_v7  ;;  %v3423_v16 = vld [vmem:[%s4454_s27 + $0x58] sm:$0xff]  ;;  %v3864_v17 = vpack.c.bf16 %v339_v14, %v337_v13  ;;  %v3420_v18 = vld [vmem:[%s4454_s27 + $0x40] sm:$0xff]  ;;  %v3422_v19 = vld [vmem:[%s4454_s27 + $0x50] sm:$0xff] }
  0x1d   : > { %3860 = vmatpush1.bf16.msra.mxu0 %v3859_v11  ;;  %v3867_v20 = vpack.c.bf16 %v3423_v16, %v3421_v15  ;;  %v3425_v21 = vld [vmem:[%s4454_s27 + $0x68] sm:$0xff]  ;;  %v3445_v23 = vld [vmem:[%s4454_s27 + $0xd8] sm:$0xff]  ;;  %v3442_v26 = vld [vmem:[%s4454_s27 + $0xc0] sm:$0xff]  ;;  %v3869_v30 = vpack.c.bf16 %v3422_v19, %v3420_v18 }
  0x1e   : > { %3863 = vmatprep.subr.msk.bf16.mxu0 %vm4439_vm2, %v3861_v12  ;;  %v3443_v22 = vld [vmem:[%s4454_s27 + $0xc8] sm:$0xff]  ;;  %v3427_v24 = vld [vmem:[%s4454_s27 + $0x78] sm:$0x1]  ;;  %v3444_v27 = vld [vmem:[%s4454_s27 + $0xd0] sm:$0xff] }
  0x1f   : > { %v3887_v25 = vpack.c.bf16 %v3445_v23, %v3443_v22  ;;  %v3889_v29 = vpack.c.bf16 %v3444_v27, %v3442_v26  ;;  %v3447_v31 = vld [vmem:[%s4454_s27 + $0xe8] sm:$0xff]  ;;  %v3449_v32 = vld [vmem:[%s4454_s27 + $0xf8] sm:$0x1]  ;;  %v3446_v33 = vld [vmem:[%s4454_s27 + $0xe0] sm:$0xff]  ;;  %v3871_v34 = vpack.c.bf16 %v3427_v24, %v3425_v21 }
  0x20   : > { %v3424_v35 = vld [vmem:[%s4454_s27 + $0x60] sm:$0xff]  ;;  %v3426_v36 = vld [vmem:[%s4454_s27 + $0x70] sm:$0x1]  ;;  %v3891_v37 = vpack.c.bf16 %v3449_v32, %v3447_v31  ;;  %v3432_v39 = vld [vmem:[%s4454_s27 + $0x88] sm:$0xff] }
  0x21   : > { %3866 = vmatpush1.bf16.msk.msra.mxu0 %vm4439_vm2, %v3864_v17  ;;  %3888 = vmatprep.subr.bf16.mxu1 %v3887_v25  ;;  %v3448_v38 = vld [vmem:[%s4454_s27 + $0xf0] sm:$0x1]  ;;  %v3434_v40 = vld [vmem:[%s4454_s27 + $0x98] sm:$0xff]  ;;  %v3431_v42 = vld [vmem:[%s4454_s27 + $0x80] sm:$0xff]  ;;  %v3874_v44 = vpack.c.bf16 %v3426_v36, %v3424_v35 }
  0x22   : > { %3868 = vmatprep.subr.bf16.mxu0 %v3867_v20  ;;  %3890 = vmatpush1.bf16.msra.mxu1 %v3889_v29  ;;  %v3894_v41 = vpack.c.bf16 %v3448_v38, %v3446_v33  ;;  %v3433_v43 = vld [vmem:[%s4454_s27 + $0x90] sm:$0xff]  ;;  %v3436_v45 = vld [vmem:[%s4454_s27 + $0xa8] sm:$0xff]  ;;  %v3438_v46 = vld [vmem:[%s4454_s27 + $0xb8] sm:$0x1]  ;;  %v3877_v47 = vpack.c.bf16 %v3434_v40, %v3432_v39 }
  0x23   : > { %3893 = vmatprep.subr.msk.bf16.mxu1 %vm4439_vm2, %v3891_v37  ;;  %v3435_v48 = vld [vmem:[%s4454_s27 + $0xa0] sm:$0xff]  ;;  %v3437_v49 = vld [vmem:[%s4454_s27 + $0xb0] sm:$0x1]  ;;  %v3879_v50 = vpack.c.bf16 %v3433_v43, %v3431_v42  ;;  %v3881_v51 = vpack.c.bf16 %v3438_v46, %v3436_v45  ;;  %v1573_v22 = vld [vmem:[%s5346_s4 + $0x8] sm:$0x3] }
  0x24   : > { %3419 = vmatmul.mubr.msk.f32.vlgmr.msra.gmra.mrb[0].mxu0 %vm346_vm3, %v331_v28  ;;  %v3884_v52 = vpack.c.bf16 %v3437_v49, %v3435_v48  ;;  %v1572_v23 = vld [vmem:[%s5346_s4] sm:$0xff]  ;;  %v3981_v24 = vld [vmem:[%s5347_s5 + $0x90] ss:$8 sps:$4 sm:$0xff]   ;;  %v3983_v25 = vld [vmem:[%s5347_s5 + $0x94] ss:$8 sps:$4 sm:$0xff]  }
  0x25   : > { %3870 = vmatpush1.bf16.msra.mxu0 %v3869_v30  ;;  %509 = vmatprep.mubr.f32.mxu0 %v4329_v1  ;;  %v3989_v26 = vld [vmem:[%s5347_s5 + $0xa4] ss:$8 sps:$4 sm:$0xff]   ;;  %v3987_v27 = vld [vmem:[%s5347_s5 + $0xa0] ss:$8 sps:$4 sm:$0xff]   ;;  %v3993_v29 = vld [vmem:[%s5347_s5 + $0xb0] ss:$8 sps:$4 sm:$0xff]  }
  0x26   : > { %3873 = vmatprep.subr.msk.bf16.mxu0 %vm4439_vm2, %v3871_v34  ;;  %3896 = vmatpush1.bf16.msk.msra.mxu1 %vm4439_vm2, %v3894_v41  ;;  %v4001_v30 = vld [vmem:[%s5347_s5 + $0xc4] ss:$8 sps:$4 sm:$0xff]   ;;  %v3999_v31 = vld [vmem:[%s5347_s5 + $0xc0] ss:$8 sps:$4 sm:$0xff]   ;;  %v4007_v32 = vld [vmem:[%s5347_s5 + $0xd4] ss:$8 sps:$4 sm:$0xff]  }
  0x27   : > { %1732 = vmatprep.subr.bf16.mxu1 %v3983_v25  ;;  %v4005_v33 = vld [vmem:[%s5347_s5 + $0xd0] ss:$8 sps:$4 sm:$0xff]   ;;  %v4013_v34 = vld [vmem:[%s5347_s5 + $0xe4] ss:$8 sps:$4 sm:$0xff]   ;;  %v4011_v35 = vld [vmem:[%s5347_s5 + $0xe0] ss:$8 sps:$4 sm:$0xff]  }
  0x28   : > { %v4019_v36 = vld [vmem:[%s5347_s5 + $0xf4] ss:$8 sps:$4 sm:$0xff]   ;;  %v4017_v37 = vld [vmem:[%s5347_s5 + $0xf0] ss:$8 sps:$4 sm:$0xff]   ;;  %v704_v45 = vld [vmem:[%s5345_s3] sm:$0xff] }
  0x29   : > { %3876 = vmatpush1.bf16.msk.msra.mxu0 %vm4439_vm2, %v3874_v44  ;;  %3452 = vmatmul.mubr.msk.f32.vlgmr.msra.gmra.mrb[0].mxu1 %vm346_vm3, %v331_v28  ;;  %v3453_v40 = vld [vmem:[%s5345_s3 + $0x10] sm:$0xff]  ;;  %v3454_v43 = vld [vmem:[%s5345_s3 + $0x18] sm:$0x3]  ;;  %v705_v48 = vld [vmem:[%s5345_s3 + $0x8] sm:$0x3] }
  0x2a   : > { %3878 = vmatprep.subr.bf16.mxu0 %v3877_v47  ;;  %1733 = vmatpush1.bf16.msra.mxu1 %v3981_v24  ;;  %v4002_v24 = vld [vmem:[%s5347_s5 + $0x270] ss:$8 sps:$4 sm:$0xff]   ;;  %v4010_v25 = vld [vmem:[%s5347_s5 + $0x284] ss:$8 sps:$4 sm:$0xff]  }
  0x2b   : > { %1734 = vmatprep.subr.bf16.mxu1 %v3989_v26  ;;  %v4008_v26 = vld [vmem:[%s5347_s5 + $0x280] ss:$8 sps:$4 sm:$0xff]  }
  0x2c   : > { %3430 = vmatmul.mubr.msk.f32.vlgmr.msra.gmra.mrb[2].mxu0 %vm346_vm3, %v331_v28 }
  0x2d   : > { %3880 = vmatpush1.bf16.msra.mxu0 %v3879_v50  ;;  %599 = vmatprep.mubr.f32.mxu0 %v4329_v1  ;;  %v3459_v50 = vld [vmem:[%s5345_s3 + $0x20] sm:$0xff] }
  0x2e   : > { %3883 = vmatprep.subr.msk.bf16.mxu0 %vm4439_vm2, %v3881_v51  ;;  %1735 = vmatpush1.bf16.msra.mxu1 %v3987_v27  ;;  %v4016_v27 = vld [vmem:[%s5347_s5 + $0x294] ss:$8 sps:$4 sm:$0xff]  }
  0x31   : > { %3886 = vmatpush1.bf16.msk.msra.mxu0 %vm4439_vm2, %v3884_v52 }
  0x34   : > { %3441 = vmatmul.mubr.msk.f32.vlgmr.msra.gmra.mrb[4].mxu0 %vm346_vm3, %v331_v28  ;;  %v3995_v28 = vld [vmem:[%s5347_s5 + $0xb4] ss:$8 sps:$4 sm:$0xff]  }
  0x35   : > { %790 = vmatprep.mubr.f32.mxu0 %v4329_v1  ;;  %1736 = vmatprep.subr.bf16.mxu1 %v3995_v28  ;;  %v4014_v28 = vld [vmem:[%s5347_s5 + $0x290] ss:$8 sps:$4 sm:$0xff]  }
  0x36   : > { %1737 = vmatpush1.bf16.msra.mxu1 %v3993_v29  ;;  %v4022_v29 = vld [vmem:[%s5347_s5 + $0x2a4] ss:$8 sps:$4 sm:$0xff]  }
  0x37   : > { %1738 = vmatprep.subr.bf16.mxu1 %v4001_v30  ;;  %v4020_v30 = vld [vmem:[%s5347_s5 + $0x2a0] ss:$8 sps:$4 sm:$0xff]  }
  0x3a   : > { %1739 = vmatpush1.bf16.msra.mxu1 %v3999_v31  ;;  %v4025_v31 = vld [vmem:[%s5347_s5 + $0x104] ss:$8 sps:$4 sm:$0xff]  }
  0x3b   : > { %1740 = vmatprep.subr.bf16.mxu1 %v4007_v32  ;;  %v4028_v32 = vld [vmem:[%s5347_s5 + $0x2b4] ss:$8 sps:$4 sm:$0xff]  }
  0x3e   : > { %1741 = vmatpush1.bf16.msra.mxu1 %v4005_v33  ;;  %v4023_v33 = vld [vmem:[%s5347_s5 + $0x100] ss:$8 sps:$4 sm:$0xff]  }
  0x3f   : > { %1742 = vmatprep.subr.bf16.mxu1 %v4013_v34  ;;  %v4026_v34 = vld [vmem:[%s5347_s5 + $0x2b0] ss:$8 sps:$4 sm:$0xff]  }
  0x42   : > { %1743 = vmatpush1.bf16.msra.mxu1 %v4011_v35  ;;  %v4031_v35 = vld [vmem:[%s5347_s5 + $0x114] ss:$8 sps:$4 sm:$0xff]  }
  0x43   : > { %1744 = vmatprep.subr.bf16.mxu1 %v4019_v36  ;;  %v4034_v36 = vld [vmem:[%s5347_s5 + $0x2c4] ss:$8 sps:$4 sm:$0xff]  }
  0x46   : > { %1745 = vmatpush1.bf16.msra.mxu1 %v4017_v37  ;;  %v4029_v37 = vld [vmem:[%s5347_s5 + $0x110] ss:$8 sps:$4 sm:$0xff]  }
  0x47   : > { %1746 = vmatprep.subr.bf16.mxu1 %v4025_v31  ;;  %v4094_v31 = vld [vmem:[%s5347_s5 + $0x484] ss:$8 sps:$4 sm:$0xff]  }
  0x4a   : > { %1747 = vmatpush1.bf16.msra.mxu1 %v4023_v33  ;;  %v4089_v33 = vld [vmem:[%s5347_s5 + $0x120] ss:$8 sps:$4 sm:$0xff]  }
  0x4b   : > { %1748 = vmatprep.subr.bf16.mxu1 %v4031_v35  ;;  %v4092_v35 = vld [vmem:[%s5347_s5 + $0x480] ss:$8 sps:$4 sm:$0xff]  }
  0x4e   : > { %1749 = vmatpush1.bf16.msra.mxu1 %v4029_v37  ;;  %v4097_v37 = vld [vmem:[%s5347_s5 + $0x134] ss:$8 sps:$4 sm:$0xff]  }
  0x8f   : > { %v344_v55 = vpop.permute.xlu0 %343 }
  0xf7   : > { %v423_v53 = vpop.f32.mrb[0].mxu0 }
  0xf8   : > { %v425_v54 = vpop.f32.mrb[1].mxu0  ;;  %v424_v58 = vadd.f32 %v423_v53, %v344_v55  ;;  %v3460_v53 = vld [vmem:[%s5345_s3 + $0x28] sm:$0x3] }
  0xf9   : > { %v426_v59 = vadd.f32 %v425_v54, %v344_v55 }
  0xfa   : > { %v428_v2 = vmax.f32 %v424_v58, 0.0  ;;  %v3464_v58 = vld [vmem:[%s5345_s3 + $0x38] sm:$0x3] }
  0xfb   : > { %v429_v5 = vmax.f32 %v426_v59, 0.0 }
  0xfc   : > { %v691_v56 = vpop.f32.mrb[0].mxu1 }
  0xfd   : > { %v693_v57 = vpop.f32.mrb[1].mxu1  ;;  %v692_v9 = vadd.f32 %v691_v56, %v344_v55 }
  0xfe   : > { %v694_v12 = vadd.f32 %v693_v57, %v344_v55 }
  0xff   : > { %v511_v60 = vpop.f32.mrb[2].mxu0  ;;  %v696_v16 = vmax.f32 %v692_v9, 0.0 }
 0x100   : > { %v512_v61 = vadd.f32 %v511_v60, %v344_v55  ;;  %v513_v62 = vpop.f32.mrb[3].mxu0  ;;  %v697_v18 = vmax.f32 %v694_v12, 0.0  ;;  %v3467_v60 = vld [vmem:[%s5345_s3 + $0x40] sm:$0xff] }
 0x101   : > { %v514_v63 = vadd.f32 %v513_v62, %v344_v55 }
 0x102   : > { %v516_v4 = vmax.f32 %v512_v61, 0.0 }
 0x103   : > { %v517_v0 = vmax.f32 %v514_v63, 0.0  ;;  %v3468_v63 = vld [vmem:[%s5345_s3 + $0x48] sm:$0x3] }
 0x104   : > { %v518_v6 = vmax.f32 %v428_v2, %v516_v4  ;;  %v3471_v4 = vld [vmem:[%s5345_s3 + $0x50] sm:$0xff] }
 0x105   : > { %v519_v7 = vmax.f32 %v429_v5, %v517_v0 }
 0x107   : > { %v601_v8 = vpop.f32.mrb[4].mxu0 }
 0x108   : > { %v602_v10 = vadd.f32 %v601_v8, %v344_v55  ;;  %v603_v11 = vpop.f32.mrb[5].mxu0  ;;  %v3475_v8 = vld [vmem:[%s5345_s3 + $0x60] sm:$0xff] }
 0x109   : > { %v604_v13 = vadd.f32 %v603_v11, %v344_v55  ;;  %v3463_v55 = vld [vmem:[%s5345_s3 + $0x30] sm:$0xff]  ;;  %v3476_v11 = vld [vmem:[%s5345_s3 + $0x68] sm:$0x3] }
 0x10a   : > { %v606_v14 = vmax.f32 %v602_v10, 0.0 }
 0x10b   : > { %v607_v15 = vmax.f32 %v604_v13, 0.0  ;;  %v3479_v13 = vld [vmem:[%s5345_s3 + $0x70] sm:$0xff] }
 0x10c   : > { %v608_v17 = vmax.f32 %v518_v6, %v606_v14  ;;  %v3472_v6 = vld [vmem:[%s5345_s3 + $0x58] sm:$0x3]  ;;  %v3986_v14 = vld [vmem:[%s5347_s5 + $0x244] ss:$8 sps:$4 sm:$0xff]  }
 0x10d   : > { %v609_v19 = vmax.f32 %v519_v7, %v607_v15 }
 0x10e   : > { %v4514_v20 = vmax.f32 %v608_v17, %v696_v16  ;;  %v3480_v16 = vld [vmem:[%s5345_s3 + $0x78] sm:$0x3]  ;;  %v3483_v17 = vld [vmem:[%s5345_s3 + $0x80] sm:$0xff] }
 0x10f   : > { %v4516_v21 = vmax.f32 %v609_v19, %v697_v18  ;;  %v3984_v18 = vld [vmem:[%s5347_s5 + $0x240] ss:$8 sps:$4 sm:$0xff]   ;;  %v3992_v19 = vld [vmem:[%s5347_s5 + $0x254] ss:$8 sps:$4 sm:$0xff]  }
 0x110   : > { %711 = vrot.lane.b32.xlu0 %v4514_v20, %s4331_s14 }
 0x111   : > { %713 = vrot.lane.b32.xlu1 %v4516_v21, %s4331_s14 }
 0x114   : > { %891 = vrot.lane.b32.xlu0 %v4516_v21, %s4332_s16 }
 0x115   : > { %889 = vrot.lane.b32.xlu1 %v4514_v20, %s4332_s16 }
 0x118   : > { %989 = vrot.lane.b32.xlu0 %v4516_v21, %s4333_s17 }
 0x119   : > { %987 = vrot.lane.b32.xlu1 %v4514_v20, %s4333_s17  ;;  %s4339_s17 = smov [#allocation3]  }
 0x11c   : > { %1087 = vrot.lane.b32.xlu0 %v4516_v21, %s4334_s21 }
 0x11d   : > { %1085 = vrot.lane.b32.xlu1 %v4514_v20, %s4334_s21  ;;  %s4268_s21 = sshll.u32 %s4339_s17, 4  ;;  %s4269_s21 = int_to_ptr.vmem [resolvable:$false] %s4268_s21 }
 0x120   : > { %1185 = vrot.lane.b32.xlu0 %v4516_v21, %s4335_s22 }
 0x121   : > { %1183 = vrot.lane.b32.xlu1 %v4514_v20, %s4335_s22  ;;  %s323_s22 = sand.u32 1, %s4318_s10  }
 0x122   : > { %s324_s26 = scalar_lea.vmem [#allocation3], %s323_s22 }
 0x123   : > { %s3356_s27 = sshll.u32 %s324_s26, 4  ;;  %s5302_s27 = int_to_ptr.vmem [resolvable:$true] %s3356_s27 }
 0x124   : > { %1283 = vrot.lane.b32.xlu0 %v4516_v21, %s4336_s23  ;;  %s4264_s16 = scalar_lea.vmem %s5302_s27, 16  ;;  %p4271_p0 = scmp.lt.s32.totalorder %s5302_s27, %s4269_s21 }
 0x125   : > { %1281 = vrot.lane.b32.xlu1 %v4514_v20, %s4336_s23  ;;  %p4265_p11 = scmp.ne.s32.totalorder %s5302_s27, %s4264_s16  ;;  %s4270_s23 = scalar_lea.vmem %s4269_s21, 32 }
 0x126   : > { %p4272_p1 = scmp.lt.s32.totalorder %s4270_s23, %s4264_s16 }
 0x127   : > { %p4266_p12 = pnand %p4265_p11, %p4428_p5 }
 0x128   : > { %1381 = vrot.lane.b32.xlu0 %v4516_v21, %s4337_s24  ;;  %p4273_p2 = por %p4272_p1, %p4271_p0 }
 0x129   : > { %1379 = vrot.lane.b32.xlu1 %v4514_v20, %s4337_s24  ;;  %p4267_p13 = pneg %p4266_p12 }
 0x12b   : > { %p4274_p3 = pnand %p4273_p2, %p4267_p13 }
 0x12c   : > { %1479 = vrot.lane.b32.xlu0 %v4516_v21, %s4338_s25 }
 0x12d   : > { %1477 = vrot.lane.b32.xlu1 %v4514_v20, %s4338_s25  ;;  %s3853_s25 = sshll.u32 %s4411_s13, 4  ;;  %s3344_s13 = scalar_lea.sflag [#allocation4], %s323_s22 }
 0x12e   : > { %s5300_s14 = scalar_lea.hbm %s5351_s9, %s3853_s25 }
 0x130   : > { %1581 = vperm.xlu0 %3979, %v1573_v22   ;;  %v3998_v22 = vld [vmem:[%s5347_s5 + $0x264] ss:$8 sps:$4 sm:$0xff]  }
 0x131   : > { %1576 = vperm.xlu1 %3980, %v1572_v23   ;;  %v4004_v23 = vld [vmem:[%s5347_s5 + $0x274] ss:$8 sps:$4 sm:$0xff]  }
 0x182   : > { %v712_v38 = vpop.permute.xlu0 %711 }
 0x183   : > { %v714_v39 = vpop.permute.xlu1 %713 }
 0x184   : > { %v716_v41 = vsel %vm715_vm4, %v712_v38, %v714_v39  ;;  %726 = vmatprep.subr.mxu0 %v714_v39  ;;  %v4032_v38 = vld [vmem:[%s5347_s5 + $0x2c0] ss:$8 sps:$4 sm:$0xff]   ;;  %v4037_v39 = vld [vmem:[%s5347_s5 + $0x4] ss:$8 sps:$4 sm:$0xff]  }
 0x185   : > { %727 = vmatpush1.msra.mxu0 %v716_v41  ;;  %1865 = vmatprep.subr.bf16.mxu1 %v4037_v39 }
 0x186   : > { %3455 = vmatmul.mubr.msk.f32.vlgmr.msra.gmra.mrb[6].mxu0 %vm719_vm5, %v3453_v40  ;;  %809 = vmatprep.subr.mxu0 %v4516_v21  ;;  %v892_v42 = vpop.permute.xlu0 %891  ;;  %v3990_v21 = vld [vmem:[%s5347_s5 + $0x250] ss:$8 sps:$4 sm:$0xff]   ;;  %v4040_v40 = vld [vmem:[%s5347_s5 + $0x364] ss:$8 sps:$4 sm:$0xff]  }
 0x187   : > { %810 = vmatpush1.msra.mxu0 %v4514_v20  ;;  %796 = vmatprep.mubr.f32.mxu0 %v4329_v1  ;;  %v890_v44 = vpop.permute.xlu1 %889  ;;  %v3484_v20 = vld [vmem:[%s5345_s3 + $0x88] sm:$0x3] }
 0x188   : > { %903 = vmatprep.subr.mxu0 %v892_v42  ;;  %v894_v46 = vsel %vm893_vm6, %v890_v44, %v892_v42 }
 0x18a   : > { %3456 = vmatmul.mubr.msk.f32.gmra.mrb[8].mxu0 %vm719_vm5, %v3454_v43  ;;  %v990_v47 = vpop.permute.xlu0 %989 }
 0x18b   : > { %873 = vmatprep.mubr.f32.mxu0 %v4329_v1  ;;  %v988_v49 = vpop.permute.xlu1 %987 }
 0x18c   : > { %v992_v51 = vsel %vm991_vm7, %v988_v49, %v990_v47 }
 0x18e   : > { %3457 = vmatmul.mubr.msk.f32.vlgmr.msra.gmra.mrb[6].mxu0 %vm719_vm5, %v704_v45  ;;  %v1088_v52 = vpop.permute.xlu0 %1087 }
 0x18f   : > { %904 = vmatpush1.msra.mxu0 %v894_v46  ;;  %879 = vmatprep.mubr.f32.mxu0 %v4329_v1  ;;  %v1086_v54 = vpop.permute.xlu1 %1085 }
 0x190   : > { %1001 = vmatprep.subr.mxu0 %v990_v47  ;;  %v1090_v56 = vsel %vm1089_vm8, %v1086_v54, %v1088_v52 }
 0x192   : > { %3458 = vmatmul.mubr.msk.f32.gmra.mrb[8].mxu0 %vm719_vm5, %v705_v48  ;;  %v1186_v57 = vpop.permute.xlu0 %1185 }
 0x193   : > { %967 = vmatprep.mubr.f32.mxu0 %v4329_v1  ;;  %v1184_v59 = vpop.permute.xlu1 %1183 }
 0x194   : > { %v1188_v61 = vsel %vm1187_vm9, %v1184_v59, %v1186_v57  ;;  %v4046_v59 = vld [vmem:[%s5347_s5 + $0x374] ss:$8 sps:$4 sm:$0xff]  }
 0x196   : > { %3461 = vmatmul.mubr.msk.f32.vlgmr.msra.gmra.mrb[6].mxu0 %vm719_vm5, %v3459_v50  ;;  %v1284_v62 = vpop.permute.xlu0 %1283 }
 0x197   : > { %1002 = vmatpush1.msra.mxu0 %v992_v51  ;;  %973 = vmatprep.mubr.f32.mxu0 %v4329_v1  ;;  %v1282_v2 = vpop.permute.xlu1 %1281 }
 0x198   : > { %1099 = vmatprep.subr.mxu0 %v1088_v52  ;;  %v1286_v5 = vsel %vm1285_vm10, %v1282_v2, %v1284_v62  ;;  %v4052_v2 = vld [vmem:[%s5347_s5 + $0x384] ss:$8 sps:$4 sm:$0xff]  }
 0x19a   : > { %3462 = vmatmul.mubr.msk.f32.gmra.mrb[8].mxu0 %vm719_vm5, %v3460_v53  ;;  %v1382_v0 = vpop.permute.xlu0 %1381  ;;  %v4035_v53 = vld [vmem:[%s5347_s5] ss:$8 sps:$4 sm:$0xff]  }
 0x19b   : > { %1065 = vmatprep.mubr.f32.mxu0 %v4329_v1  ;;  %v1380_v7 = vpop.permute.xlu1 %1379 }
 0x19c   : > { %v1384_v9 = vsel %vm1383_vm11, %v1380_v7, %v1382_v0  ;;  %v4053_v7 = vld [vmem:[%s5347_s5 + $0x30] ss:$8 sps:$4 sm:$0xff]  }
 0x19e   : > { %3465 = vmatmul.mubr.msk.f32.vlgmr.msra.gmra.mrb[6].mxu0 %vm719_vm5, %v3463_v55  ;;  %v1480_v10 = vpop.permute.xlu0 %1479  ;;  %v4038_v55 = vld [vmem:[%s5347_s5 + $0x360] ss:$8 sps:$4 sm:$0xff]  }
 0x19f   : > { %1100 = vmatpush1.msra.mxu0 %v1090_v56  ;;  %1071 = vmatprep.mubr.f32.mxu0 %v4329_v1  ;;  %v1478_v12 = vpop.permute.xlu1 %1477 }
 0x1a0   : > { %1197 = vmatprep.subr.mxu0 %v1186_v57  ;;  %v1482_v15 = vsel %vm1481_vm12, %v1478_v12, %v1480_v10  ;;  %v4062_v12 = vld [vmem:[%s5347_s5 + $0x3a0] ss:$8 sps:$4 sm:$0xff]  }
 0x1a2   : > { %3466 = vmatmul.mubr.msk.f32.gmra.mrb[8].mxu0 %vm719_vm5, %v3464_v58  ;;  %v4043_v58 = vld [vmem:[%s5347_s5 + $0x14] ss:$8 sps:$4 sm:$0xff]  }
 0x1a3   : > { %1163 = vmatprep.mubr.f32.mxu0 %v4329_v1 }
 0x1a6   : > { %3469 = vmatmul.mubr.msk.f32.vlgmr.msra.gmra.mrb[6].mxu0 %vm719_vm5, %v3467_v60 }
 0x1a7   : > { %1198 = vmatpush1.msra.mxu0 %v1188_v61  ;;  %1169 = vmatprep.mubr.f32.mxu0 %v4329_v1  ;;  %v4041_v61 = vld [vmem:[%s5347_s5 + $0x10] ss:$8 sps:$4 sm:$0xff]  }
 0x1a8   : > { %1295 = vmatprep.subr.mxu0 %v1284_v62  ;;  %v4044_v62 = vld [vmem:[%s5347_s5 + $0x370] ss:$8 sps:$4 sm:$0xff]  }
 0x1aa   : > { %3470 = vmatmul.mubr.msk.f32.gmra.mrb[8].mxu0 %vm719_vm5, %v3468_v63  ;;  %v4049_v63 = vld [vmem:[%s5347_s5 + $0x24] ss:$8 sps:$4 sm:$0xff]  }
 0x1ab   : > { %1261 = vmatprep.mubr.f32.mxu0 %v4329_v1 }
 0x1ae   : > { %3473 = vmatmul.mubr.msk.f32.vlgmr.msra.gmra.mrb[6].mxu0 %vm719_vm5, %v3471_v4  ;;  %v4047_v4 = vld [vmem:[%s5347_s5 + $0x20] ss:$8 sps:$4 sm:$0xff]  }
 0x1af   : > { %1296 = vmatpush1.msra.mxu0 %v1286_v5  ;;  %1267 = vmatprep.mubr.f32.mxu0 %v4329_v1  ;;  %v4050_v5 = vld [vmem:[%s5347_s5 + $0x380] ss:$8 sps:$4 sm:$0xff]  }
 0x1b0   : > { %1393 = vmatprep.subr.mxu0 %v1382_v0  ;;  %v1577_v41 = vpop.permute.xlu1 %1576  ;;  %v4055_v0 = vld [vmem:[%s5347_s5 + $0x34] ss:$8 sps:$4 sm:$0xff]  }
 0x1b2   : > { %3474 = vmatmul.mubr.msk.f32.gmra.mrb[8].mxu0 %vm719_vm5, %v3472_v6  ;;  %v4058_v6 = vld [vmem:[%s5347_s5 + $0x394] ss:$8 sps:$4 sm:$0xff]  }
 0x1b3   : > { %1359 = vmatprep.mubr.f32.mxu0 %v4329_v1 }
 0x1b6   : > { %3477 = vmatmul.mubr.msk.f32.vlgmr.msra.gmra.mrb[6].mxu0 %vm719_vm5, %v3475_v8  ;;  %v4056_v8 = vld [vmem:[%s5347_s5 + $0x390] ss:$8 sps:$4 sm:$0xff]  }
 0x1b7   : > { %1394 = vmatpush1.msra.mxu0 %v1384_v9  ;;  %1365 = vmatprep.mubr.f32.mxu0 %v4329_v1  ;;  %v4061_v9 = vld [vmem:[%s5347_s5 + $0x44] ss:$8 sps:$4 sm:$0xff]  }
 0x1b8   : > { %1491 = vmatprep.subr.mxu0 %v1480_v10  ;;  %v4064_v10 = vld [vmem:[%s5347_s5 + $0x3a4] ss:$8 sps:$4 sm:$0xff]  }
 0x1ba   : > { %3478 = vmatmul.mubr.msk.f32.gmra.mrb[8].mxu0 %vm719_vm5, %v3476_v11  ;;  %v4059_v11 = vld [vmem:[%s5347_s5 + $0x40] ss:$8 sps:$4 sm:$0xff]  }
 0x1bb   : > { %1457 = vmatprep.mubr.f32.mxu0 %v4329_v1 }
 0x1be   : > { %3481 = vmatmul.mubr.msk.f32.vlgmr.msra.gmra.mrb[6].mxu0 %vm719_vm5, %v3479_v13  ;;  %v4067_v13 = vld [vmem:[%s5347_s5 + $0x54] ss:$8 sps:$4 sm:$0xff]  }
 0x1bf   : > { %1492 = vmatpush1.msra.mxu0 %v1482_v15  ;;  %1463 = vmatprep.mubr.f32.mxu0 %v4329_v1  ;;  %v4065_v15 = vld [vmem:[%s5347_s5 + $0x50] ss:$8 sps:$4 sm:$0xff]  }
 0x1c0   : > { %2339 = vmatprep.subr.bf16.mxu0 %v3986_v14  ;;  %v4070_v14 = vld [vmem:[%s5347_s5 + $0x3b4] ss:$8 sps:$4 sm:$0xff]  }
 0x1c2   : > { %3482 = vmatmul.mubr.msk.f32.gmra.mrb[8].mxu0 %vm719_vm5, %v3480_v16  ;;  %v4068_v16 = vld [vmem:[%s5347_s5 + $0x3b0] ss:$8 sps:$4 sm:$0xff]  }
 0x1c3   : > { %1555 = vmatprep.mubr.f32.mxu0 %v4329_v1 }
 0x1c6   : > { %3485 = vmatmul.mubr.msk.f32.vlgmr.msra.gmra.mrb[6].mxu0 %vm719_vm5, %v3483_v17  ;;  %v4073_v17 = vld [vmem:[%s5347_s5 + $0x64] ss:$8 sps:$4 sm:$0xff]  }
 0x1c7   : > { %1561 = vmatprep.mubr.f32.mxu0 %v4329_v1  ;;  %2340 = vmatpush1.bf16.msra.mxu0 %v3984_v18  ;;  %v3996_v1 = vld [vmem:[%s5347_s5 + $0x260] ss:$8 sps:$4 sm:$0xff]   ;;  %v4076_v18 = vld [vmem:[%s5347_s5 + $0x3c4] ss:$8 sps:$4 sm:$0xff]  }
 0x1c8   : > { %2341 = vmatprep.subr.bf16.mxu0 %v3992_v19  ;;  %v4071_v19 = vld [vmem:[%s5347_s5 + $0x60] ss:$8 sps:$4 sm:$0xff]  }
 0x1ca   : > { %3486 = vmatmul.mubr.msk.f32.gmra.mrb[8].mxu0 %vm719_vm5, %v3484_v20  ;;  %v4074_v20 = vld [vmem:[%s5347_s5 + $0x3c0] ss:$8 sps:$4 sm:$0xff]  }
 0x1cb   : > { %2342 = vmatpush1.bf16.msra.mxu0 %v3990_v21  ;;  %v4079_v21 = vld [vmem:[%s5347_s5 + $0x74] ss:$8 sps:$4 sm:$0xff]  }
 0x1cc   : > { %2343 = vmatprep.subr.bf16.mxu0 %v3998_v22  ;;  %v4082_v22 = vld [vmem:[%s5347_s5 + $0x3d4] ss:$8 sps:$4 sm:$0xff]  }
 0x1cf   : > { %2344 = vmatpush1.bf16.msra.mxu0 %v3996_v1  ;;  %v4077_v1 = vld [vmem:[%s5347_s5 + $0x70] ss:$8 sps:$4 sm:$0xff]  }
 0x1d0   : > { %2345 = vmatprep.subr.bf16.mxu0 %v4004_v23  ;;  %v4080_v23 = vld [vmem:[%s5347_s5 + $0x3d0] ss:$8 sps:$4 sm:$0xff]  }
 0x1d3   : > { %2346 = vmatpush1.bf16.msra.mxu0 %v4002_v24  ;;  %v4085_v24 = vld [vmem:[%s5347_s5 + $0x84] ss:$8 sps:$4 sm:$0xff]  }
 0x1d4   : > { %2347 = vmatprep.subr.bf16.mxu0 %v4010_v25  ;;  %v4088_v25 = vld [vmem:[%s5347_s5 + $0x3e4] ss:$8 sps:$4 sm:$0xff]  }
 0x1d7   : > { %2348 = vmatpush1.bf16.msra.mxu0 %v4008_v26  ;;  %v4865_v26 = vpop.permute.xlu0 %1581 }
 0x1d8   : > { %2349 = vmatprep.subr.bf16.mxu0 %v4016_v27 }
 0x1db   : > { %2350 = vmatpush1.bf16.msra.mxu0 %v4014_v28  ;;  %v4083_v28 = vld [vmem:[%s5347_s5 + $0x80] ss:$8 sps:$4 sm:$0xff]  }
 0x1dc   : > { %2351 = vmatprep.subr.bf16.mxu0 %v4022_v29  ;;  %v4086_v29 = vld [vmem:[%s5347_s5 + $0x3e0] ss:$8 sps:$4 sm:$0xff]  }
 0x1df   : > { %2352 = vmatpush1.bf16.msra.mxu0 %v4020_v30  ;;  %v4091_v30 = vld [vmem:[%s5347_s5 + $0x124] ss:$8 sps:$4 sm:$0xff]  }
 0x1e0   : > { %2353 = vmatprep.subr.bf16.mxu0 %v4028_v32 }
 0x1e3   : > { %2354 = vmatpush1.bf16.msra.mxu0 %v4026_v34 }
 0x1e4   : > { %2355 = vmatprep.subr.bf16.mxu0 %v4034_v36 }
 0x1e7   : > { %2356 = vmatpush1.bf16.msra.mxu0 %v4032_v38  ;;  %v4100_v38 = vld [vmem:[%s5347_s5 + $0x494] ss:$8 sps:$4 sm:$0xff]  }
 0x1e8   : > { %2655 = vmatprep.subr.bf16.mxu0 %v4040_v40  ;;  %v4095_v40 = vld [vmem:[%s5347_s5 + $0x130] ss:$8 sps:$4 sm:$0xff]  }
 0x299   : > { %v1557_v42 = vpop.f32.mrb[6].mxu0 }
 0x29a   : > { %v1584_v43 = vadd.f32 %v1577_v41, %v1557_v42  ;;  %v1559_v44 = vpop.f32.mrb[7].mxu0  ;;  %v4103_v42 = vld [vmem:[%s5347_s5 + $0x144] ss:$8 sps:$4 sm:$0xff]  }
 0x29b   : > { %v1585_v45 = vadd.f32 %v1577_v41, %v1559_v44  ;;  %v4098_v41 = vld [vmem:[%s5347_s5 + $0x490] ss:$8 sps:$4 sm:$0xff]   ;;  %v4101_v44 = vld [vmem:[%s5347_s5 + $0x140] ss:$8 sps:$4 sm:$0xff]  }
 0x29c   : > { %v1588_v46 = vmax.f32 %v1584_v43, 0.0  ;;  %v4106_v43 = vld [vmem:[%s5347_s5 + $0x4a4] ss:$8 sps:$4 sm:$0xff]  }
 0x29d   : > { %v1589_v47 = vmax.f32 %v1585_v45, 0.0  ;;  %v4745_v48 = vpop.f32.mrb[8].mxu0  ;;  %v4104_v45 = vld [vmem:[%s5347_s5 + $0x4a0] ss:$8 sps:$4 sm:$0xff]  }
 0x29e   : > { %v4747_v49 = vpack.c.bf16 %v1588_v46, %v1588_v46  ;;  %v4749_v50 = vpop.f32.mrb[9].mxu0  ;;  %v4109_v46 = vld [vmem:[%s5347_s5 + $0x154] ss:$8 sps:$4 sm:$0xff]  }
 0x29f   : > { %v4751_v51 = vpack.c.bf16 %v1589_v47, %v1589_v47  ;;  %v1587_v27 = vadd.f32 %v4865_v26, %v4749_v50  ;;  %v4112_v47 = vld [vmem:[%s5347_s5 + $0x4b4] ss:$8 sps:$4 sm:$0xff]   ;;  %v4107_v50 = vld [vmem:[%s5347_s5 + $0x150] ss:$8 sps:$4 sm:$0xff]  }
 0x2a0   : > { %v4764_v56 = vshrl.u32 %v4747_v49, 16  ;;  %v2243_v57 = vrot.slane %v4747_v49, 2  ;;  %v2559_v34 = vrot.slane %v4747_v49, 3 }
 0x2a1   : > { %v4754_v52 = vshrl.u32 %v4751_v51, 16  ;;  %v2244_v54 = vrot.slane %v4751_v51, 2  ;;  %v2560_v60 = vrot.slane %v4751_v51, 3  ;;  %v1591_v32 = vmax.f32 %v1587_v27, 0.0  ;;  %v4161_v27 = vld [vmem:[%s5347_s5 + $0x210] ss:$8 sps:$4 sm:$0xff]  }
 0x2a2   : > { %v1928_v36 = vrot.slane %v4751_v51, 1 }
 0x2a3   : > { %3523 = vmatprep.mubr.msk.bf16.mxu1 %vm1728_vm13, %v4754_v52  ;;  %3653 = vmatprep.mubr.msk.bf16.mxu0 %vm1728_vm13, %v2244_v54  ;;  %v4895_v39 = vpack.c.bf16 %v1591_v32, %v1591_v32  ;;  %v4118_v54 = vld [vmem:[%s5347_s5 + $0x4c4] ss:$8 sps:$4 sm:$0xff]   ;;  %v4172_v32 = vld [vmem:[%s5347_s5 + $0x2d4] ss:$8 sps:$4 sm:$0xff]  }
 0x2a4   : > { %1765 = vmatmul.mubr.bf16.vlgmr.msra.gmra.mrb[4].mxu1 %v4764_v56  ;;  %2372 = vmatmul.mubr.bf16.vlgmr.msra.gmra.mrb[12].mxu0 %v2243_v57  ;;  %v4116_v57 = vld [vmem:[%s5347_s5 + $0x4c0] ss:$8 sps:$4 sm:$0xff]  }
 0x2a5   : > { %1866 = vmatpush1.bf16.msra.mxu1 %v4035_v53  ;;  %2656 = vmatpush1.bf16.msra.mxu0 %v4038_v55  ;;  %v4115_v53 = vld [vmem:[%s5347_s5 + $0x164] ss:$8 sps:$4 sm:$0xff]   ;;  %v4113_v55 = vld [vmem:[%s5347_s5 + $0x160] ss:$8 sps:$4 sm:$0xff]  }
 0x2a6   : > { %3542 = vmatprep.mubr.msk.bf16.mxu1 %vm1728_vm13, %v4751_v51  ;;  %3727 = vmatprep.mubr.msk.bf16.mxu0 %vm1728_vm13, %v2560_v60  ;;  %v4110_v51 = vld [vmem:[%s5347_s5 + $0x4b0] ss:$8 sps:$4 sm:$0xff]  }
 0x2a7   : > { %1867 = vmatprep.subr.bf16.mxu1 %v4043_v58  ;;  %2657 = vmatprep.subr.bf16.mxu0 %v4046_v59  ;;  %v4121_v58 = vld [vmem:[%s5347_s5 + $0x174] ss:$8 sps:$4 sm:$0xff]   ;;  %v4119_v60 = vld [vmem:[%s5347_s5 + $0x170] ss:$8 sps:$4 sm:$0xff]  }
 0x2a8   : > { %v4124_v59 = vld [vmem:[%s5347_s5 + $0x4d4] ss:$8 sps:$4 sm:$0xff]  }
 0x2a9   : > { %1868 = vmatpush1.bf16.msra.mxu1 %v4041_v61  ;;  %2658 = vmatpush1.bf16.msra.mxu0 %v4044_v62  ;;  %v4122_v61 = vld [vmem:[%s5347_s5 + $0x4d0] ss:$8 sps:$4 sm:$0xff]   ;;  %v4127_v62 = vld [vmem:[%s5347_s5 + $0x184] ss:$8 sps:$4 sm:$0xff]  }
 0x2aa   : > { %1869 = vmatprep.subr.bf16.mxu1 %v4049_v63  ;;  %2659 = vmatprep.subr.bf16.mxu0 %v4052_v2  ;;  %v4130_v63 = vld [vmem:[%s5347_s5 + $0x4e4] ss:$8 sps:$4 sm:$0xff]   ;;  %v4125_v2 = vld [vmem:[%s5347_s5 + $0x180] ss:$8 sps:$4 sm:$0xff]  }
 0x2ad   : > { %1870 = vmatpush1.bf16.msra.mxu1 %v4047_v4  ;;  %2660 = vmatpush1.bf16.msra.mxu0 %v4050_v5  ;;  %v4128_v4 = vld [vmem:[%s5347_s5 + $0x4e0] ss:$8 sps:$4 sm:$0xff]   ;;  %v4133_v5 = vld [vmem:[%s5347_s5 + $0x194] ss:$8 sps:$4 sm:$0xff]  }
 0x2ae   : > { %1871 = vmatprep.subr.bf16.mxu1 %v4055_v0  ;;  %2661 = vmatprep.subr.bf16.mxu0 %v4058_v6  ;;  %v4136_v0 = vld [vmem:[%s5347_s5 + $0x4f4] ss:$8 sps:$4 sm:$0xff]   ;;  %v4131_v6 = vld [vmem:[%s5347_s5 + $0x190] ss:$8 sps:$4 sm:$0xff]  }
 0x2b1   : > { %1872 = vmatpush1.bf16.msra.mxu1 %v4053_v7  ;;  %2662 = vmatpush1.bf16.msra.mxu0 %v4056_v8  ;;  %v4134_v7 = vld [vmem:[%s5347_s5 + $0x4f0] ss:$8 sps:$4 sm:$0xff]   ;;  %v4139_v8 = vld [vmem:[%s5347_s5 + $0x1a4] ss:$8 sps:$4 sm:$0xff]  }
 0x2b2   : > { %1873 = vmatprep.subr.bf16.mxu1 %v4061_v9  ;;  %2663 = vmatprep.subr.bf16.mxu0 %v4064_v10  ;;  %v1586_v9 = vadd.f32 %v4865_v26, %v4745_v48  ;;  %v4142_v10 = vld [vmem:[%s5347_s5 + $0x504] ss:$8 sps:$4 sm:$0xff]   ;;  %v4145_v48 = vld [vmem:[%s5347_s5 + $0x1b4] ss:$8 sps:$4 sm:$0xff]  }
 0x2b3   : > { %v4163_v26 = vld [vmem:[%s5347_s5 + $0x214] ss:$8 sps:$4 sm:$0xff]  }
 0x2b5   : > { %1874 = vmatpush1.bf16.msra.mxu1 %v4059_v11  ;;  %2664 = vmatpush1.bf16.msra.mxu0 %v4062_v12  ;;  %v4137_v11 = vld [vmem:[%s5347_s5 + $0x1a0] ss:$8 sps:$4 sm:$0xff]  }
 0x2b6   : > { %1875 = vmatprep.subr.bf16.mxu1 %v4067_v13  ;;  %2665 = vmatprep.subr.bf16.mxu0 %v4070_v14  ;;  %v4140_v12 = vld [vmem:[%s5347_s5 + $0x500] ss:$8 sps:$4 sm:$0xff]   ;;  %v1590_v13 = vmax.f32 %v1586_v9, 0.0  ;;  %v4143_v14 = vld [vmem:[%s5347_s5 + $0x1b0] ss:$8 sps:$4 sm:$0xff]  }
 0x2b7   : > { %v4215_v9 = vld [vmem:[%s5347_s5 + $0x450] ss:$8 sps:$4 sm:$0xff]  }
 0x2b9   : > { %1876 = vmatpush1.bf16.msra.mxu1 %v4065_v15  ;;  %2666 = vmatpush1.bf16.msra.mxu0 %v4068_v16  ;;  %v1927_v15 = vrot.slane %v4747_v49, 1  ;;  %v4148_v16 = vld [vmem:[%s5347_s5 + $0x1c4] ss:$8 sps:$4 sm:$0xff]  }
 0x2ba   : > { %1877 = vmatprep.subr.bf16.mxu1 %v4073_v17  ;;  %2667 = vmatprep.subr.bf16.mxu0 %v4076_v18  ;;  %v5003_v17 = vpack.c.bf16 %v1590_v13, %v1590_v13  ;;  %v2086_v18 = vrot.slane %v4754_v52, 1  ;;  %v4226_v13 = vld [vmem:[%s5347_s5 + $0x514] ss:$8 sps:$4 sm:$0xff]  }
 0x2bd   : > { %1878 = vmatpush1.bf16.msra.mxu1 %v4071_v19  ;;  %2668 = vmatpush1.bf16.msra.mxu0 %v4074_v20  ;;  %v4146_v19 = vld [vmem:[%s5347_s5 + $0x1c0] ss:$8 sps:$4 sm:$0xff]   ;;  %v4149_v20 = vld [vmem:[%s5347_s5 + $0x1d0] ss:$8 sps:$4 sm:$0xff]  }
 0x2be   : > { %1879 = vmatprep.subr.bf16.mxu1 %v4079_v21  ;;  %2669 = vmatprep.subr.bf16.mxu0 %v4082_v22  ;;  %v4154_v21 = vld [vmem:[%s5347_s5 + $0x1e4] ss:$8 sps:$4 sm:$0xff]   ;;  %v4152_v22 = vld [vmem:[%s5347_s5 + $0x1e0] ss:$8 sps:$4 sm:$0xff]  }
 0x2c1   : > { %1880 = vmatpush1.bf16.msra.mxu1 %v4077_v1  ;;  %2670 = vmatpush1.bf16.msra.mxu0 %v4080_v23  ;;  %v4157_v1 = vld [vmem:[%s5347_s5 + $0x1f4] ss:$8 sps:$4 sm:$0xff]   ;;  %v4155_v23 = vld [vmem:[%s5347_s5 + $0x1f0] ss:$8 sps:$4 sm:$0xff]  }
 0x2c2   : > { %1881 = vmatprep.subr.bf16.mxu1 %v4085_v24  ;;  %2671 = vmatprep.subr.bf16.mxu0 %v4088_v25  ;;  %v4160_v24 = vld [vmem:[%s5347_s5 + $0x204] ss:$8 sps:$4 sm:$0xff]   ;;  %v4158_v25 = vld [vmem:[%s5347_s5 + $0x200] ss:$8 sps:$4 sm:$0xff]  }
 0x2c5   : > { %1882 = vmatpush1.bf16.msra.mxu1 %v4083_v28  ;;  %2672 = vmatpush1.bf16.msra.mxu0 %v4086_v29  ;;  %v4166_v28 = vld [vmem:[%s5347_s5 + $0x224] ss:$8 sps:$4 sm:$0xff]   ;;  %v4164_v29 = vld [vmem:[%s5347_s5 + $0x220] ss:$8 sps:$4 sm:$0xff]  }
 0x2c6   : > { %2023 = vmatprep.subr.bf16.mxu1 %v4091_v30  ;;  %2970 = vmatprep.subr.bf16.mxu0 %v4094_v31  ;;  %v4169_v30 = vld [vmem:[%s5347_s5 + $0x234] ss:$8 sps:$4 sm:$0xff]   ;;  %v4167_v31 = vld [vmem:[%s5347_s5 + $0x230] ss:$8 sps:$4 sm:$0xff]  }
 0x2c8   : > { %1898 = vmatmul.mubr.bf16.vlgmr.msra.gmra.mrb[8].mxu1 %v4747_v49  ;;  %2688 = vmatmul.mubr.bf16.vlgmr.msra.gmra.mrb[16].mxu0 %v2559_v34  ;;  %v4151_v49 = vld [vmem:[%s5347_s5 + $0x1d4] ss:$8 sps:$4 sm:$0xff]   ;;  %v2085_v34 = vrot.slane %v4764_v56, 1 }
 0x2c9   : > { %2024 = vmatpush1.bf16.msra.mxu1 %v4089_v33  ;;  %3579 = vmatprep.mubr.msk.bf16.mxu1 %vm1728_vm13, %v1928_v36  ;;  %v4170_v33 = vld [vmem:[%s5347_s5 + $0x2d0] ss:$8 sps:$4 sm:$0xff]   ;;  %v2402_v36 = vrot.slane %v4754_v52, 2 }
 0x2ca   : > { %2971 = vmatpush1.bf16.msra.mxu0 %v4092_v35  ;;  %3801 = vmatprep.mubr.msk.bf16.mxu0 %vm1728_vm13, %v4895_v39  ;;  %v4175_v35 = vld [vmem:[%s5347_s5 + $0x2e4] ss:$8 sps:$4 sm:$0xff]  }
 0x2cb   : > { %2025 = vmatprep.subr.bf16.mxu1 %v4097_v37  ;;  %2972 = vmatprep.subr.bf16.mxu0 %v4100_v38  ;;  %v4173_v37 = vld [vmem:[%s5347_s5 + $0x2e0] ss:$8 sps:$4 sm:$0xff]   ;;  %v4178_v38 = vld [vmem:[%s5347_s5 + $0x2f4] ss:$8 sps:$4 sm:$0xff]  }
 0x2cd   : > { %2026 = vmatpush1.bf16.msra.mxu1 %v4095_v40  ;;  %v4176_v40 = vld [vmem:[%s5347_s5 + $0x2f0] ss:$8 sps:$4 sm:$0xff]  }
 0x2ce   : > { %2973 = vmatpush1.bf16.msra.mxu0 %v4098_v41  ;;  %2027 = vmatprep.subr.bf16.mxu1 %v4103_v42  ;;  %v4181_v41 = vld [vmem:[%s5347_s5 + $0x304] ss:$8 sps:$4 sm:$0xff]   ;;  %v4179_v42 = vld [vmem:[%s5347_s5 + $0x300] ss:$8 sps:$4 sm:$0xff]  }
 0x2cf   : > { %2974 = vmatprep.subr.bf16.mxu0 %v4106_v43  ;;  %v4184_v43 = vld [vmem:[%s5347_s5 + $0x314] ss:$8 sps:$4 sm:$0xff]  }
 0x2d1   : > { %2028 = vmatpush1.bf16.msra.mxu1 %v4101_v44  ;;  %v4182_v44 = vld [vmem:[%s5347_s5 + $0x310] ss:$8 sps:$4 sm:$0xff]  }
 0x2d2   : > { %2975 = vmatpush1.bf16.msra.mxu0 %v4104_v45  ;;  %2029 = vmatprep.subr.bf16.mxu1 %v4109_v46  ;;  %v4187_v45 = vld [vmem:[%s5347_s5 + $0x324] ss:$8 sps:$4 sm:$0xff]   ;;  %v4185_v46 = vld [vmem:[%s5347_s5 + $0x320] ss:$8 sps:$4 sm:$0xff]  }
 0x2d3   : > { %2976 = vmatprep.subr.bf16.mxu0 %v4112_v47  ;;  %v4190_v47 = vld [vmem:[%s5347_s5 + $0x334] ss:$8 sps:$4 sm:$0xff]  }
 0x2d5   : > { %2030 = vmatpush1.bf16.msra.mxu1 %v4107_v50  ;;  %v4188_v50 = vld [vmem:[%s5347_s5 + $0x330] ss:$8 sps:$4 sm:$0xff]  }
 0x2d6   : > { %2977 = vmatpush1.bf16.msra.mxu0 %v4110_v51  ;;  %2031 = vmatprep.subr.bf16.mxu1 %v4115_v53  ;;  %v4193_v51 = vld [vmem:[%s5347_s5 + $0x344] ss:$8 sps:$4 sm:$0xff]   ;;  %v4191_v53 = vld [vmem:[%s5347_s5 + $0x340] ss:$8 sps:$4 sm:$0xff]  }
 0x2d7   : > { %2978 = vmatprep.subr.bf16.mxu0 %v4118_v54  ;;  %v4196_v54 = vld [vmem:[%s5347_s5 + $0x354] ss:$8 sps:$4 sm:$0xff]  }
 0x2d9   : > { %2032 = vmatpush1.bf16.msra.mxu1 %v4113_v55  ;;  %v4194_v55 = vld [vmem:[%s5347_s5 + $0x350] ss:$8 sps:$4 sm:$0xff]  }
 0x2da   : > { %2979 = vmatpush1.bf16.msra.mxu0 %v4116_v57  ;;  %2033 = vmatprep.subr.bf16.mxu1 %v4121_v58  ;;  %v4199_v57 = vld [vmem:[%s5347_s5 + $0x3f4] ss:$8 sps:$4 sm:$0xff]   ;;  %v4197_v58 = vld [vmem:[%s5347_s5 + $0x3f0] ss:$8 sps:$4 sm:$0xff]  }
 0x2db   : > { %2980 = vmatprep.subr.bf16.mxu0 %v4124_v59  ;;  %v2401_v59 = vrot.slane %v4764_v56, 2 }
 0x2dd   : > { %2034 = vmatpush1.bf16.msra.mxu1 %v4119_v60  ;;  %v4202_v60 = vld [vmem:[%s5347_s5 + $0x404] ss:$8 sps:$4 sm:$0xff]  }
 0x2de   : > { %2981 = vmatpush1.bf16.msra.mxu0 %v4122_v61  ;;  %2035 = vmatprep.subr.bf16.mxu1 %v4127_v62  ;;  %v2718_v61 = vrot.slane %v4754_v52, 3  ;;  %v4200_v62 = vld [vmem:[%s5347_s5 + $0x400] ss:$8 sps:$4 sm:$0xff]   ;;  %v4208_v52 = vld [vmem:[%s5347_s5 + $0x424] ss:$8 sps:$4 sm:$0xff]  }
 0x2df   : > { %2982 = vmatprep.subr.bf16.mxu0 %v4130_v63  ;;  %v4205_v63 = vld [vmem:[%s5347_s5 + $0x414] ss:$8 sps:$4 sm:$0xff]  }
 0x2e1   : > { %2036 = vmatpush1.bf16.msra.mxu1 %v4125_v2  ;;  %v4203_v2 = vld [vmem:[%s5347_s5 + $0x410] ss:$8 sps:$4 sm:$0xff]  }
 0x2e2   : > { %2983 = vmatpush1.bf16.msra.mxu0 %v4128_v4  ;;  %2037 = vmatprep.subr.bf16.mxu1 %v4133_v5  ;;  %v4206_v4 = vld [vmem:[%s5347_s5 + $0x420] ss:$8 sps:$4 sm:$0xff]   ;;  %v4211_v5 = vld [vmem:[%s5347_s5 + $0x434] ss:$8 sps:$4 sm:$0xff]  }
 0x2e3   : > { %2984 = vmatprep.subr.bf16.mxu0 %v4136_v0  ;;  %v4209_v0 = vld [vmem:[%s5347_s5 + $0x430] ss:$8 sps:$4 sm:$0xff]  }
 0x2e5   : > { %2038 = vmatpush1.bf16.msra.mxu1 %v4131_v6  ;;  %v4214_v6 = vld [vmem:[%s5347_s5 + $0x444] ss:$8 sps:$4 sm:$0xff]  }
 0x2e6   : > { %2985 = vmatpush1.bf16.msra.mxu0 %v4134_v7  ;;  %2039 = vmatprep.subr.bf16.mxu1 %v4139_v8  ;;  %v4212_v7 = vld [vmem:[%s5347_s5 + $0x440] ss:$8 sps:$4 sm:$0xff]   ;;  %v4217_v8 = vld [vmem:[%s5347_s5 + $0x454] ss:$8 sps:$4 sm:$0xff]  }
 0x2e7   : > { %2986 = vmatprep.subr.bf16.mxu0 %v4142_v10  ;;  %v4220_v10 = vld [vmem:[%s5347_s5 + $0x464] ss:$8 sps:$4 sm:$0xff]  }
 0x2e9   : > { %2040 = vmatpush1.bf16.msra.mxu1 %v4137_v11  ;;  %v4218_v11 = vld [vmem:[%s5347_s5 + $0x460] ss:$8 sps:$4 sm:$0xff]  }
 0x2ea   : > { %2987 = vmatpush1.bf16.msra.mxu0 %v4140_v12  ;;  %2181 = vmatprep.subr.bf16.mxu1 %v4145_v48  ;;  %v4223_v12 = vld [vmem:[%s5347_s5 + $0x474] ss:$8 sps:$4 sm:$0xff]   ;;  %v4221_v48 = vld [vmem:[%s5347_s5 + $0x470] ss:$8 sps:$4 sm:$0xff]  }
 0x2eb   : > { %3301 = vmatprep.subr.bf16.mxu0 %v4330_v3 }
 0x2ec   : > { %2056 = vmatmul.mubr.bf16.vlgmr.msra.gmra.mrb[12].mxu1 %v1927_v15  ;;  %v2717_v15 = vrot.slane %v4764_v56, 3  ;;  %v4232_v56 = vld [vmem:[%s5347_s5 + $0x534] ss:$8 sps:$4 sm:$0xff]  }
 0x2ed   : > { %3003 = vmatmul.mubr.bf16.vlgmr.msra.gmra.mrb[20].mxu0 %v5003_v17  ;;  %2182 = vmatpush1.bf16.msra.mxu1 %v4143_v14  ;;  %v4224_v14 = vld [vmem:[%s5347_s5 + $0x510] ss:$8 sps:$4 sm:$0xff]  }
 0x2ee   : > { %3616 = vmatprep.mubr.msk.bf16.mxu1 %vm1728_vm13, %v2086_v18  ;;  %2183 = vmatprep.subr.bf16.mxu1 %v4148_v16  ;;  %v4229_v16 = vld [vmem:[%s5347_s5 + $0x524] ss:$8 sps:$4 sm:$0xff]   ;;  %v3035_v18 = vshrl.u32 %v4895_v39, 16 }
 0x2ef   : > { %v4235_v39 = vld [vmem:[%s5347_s5 + $0x544] ss:$8 sps:$4 sm:$0xff]  }
 0x2f1   : > { %2184 = vmatpush1.bf16.msra.mxu1 %v4146_v19  ;;  %v4227_v19 = vld [vmem:[%s5347_s5 + $0x520] ss:$8 sps:$4 sm:$0xff]  }
 0x2f2   : > { %2185 = vmatprep.subr.bf16.mxu1 %v4151_v49  ;;  %v4230_v49 = vld [vmem:[%s5347_s5 + $0x530] ss:$8 sps:$4 sm:$0xff]  }
 0x2f5   : > { %2186 = vmatpush1.bf16.msra.mxu1 %v4149_v20  ;;  %v4233_v20 = vld [vmem:[%s5347_s5 + $0x540] ss:$8 sps:$4 sm:$0xff]  }
 0x2f6   : > { %2187 = vmatprep.subr.bf16.mxu1 %v4154_v21  ;;  %v4238_v21 = vld [vmem:[%s5347_s5 + $0x554] ss:$8 sps:$4 sm:$0xff]  }
 0x2f9   : > { %2188 = vmatpush1.bf16.msra.mxu1 %v4152_v22  ;;  %v4236_v22 = vld [vmem:[%s5347_s5 + $0x550] ss:$8 sps:$4 sm:$0xff]  }
 0x2fa   : > { %2189 = vmatprep.subr.bf16.mxu1 %v4157_v1  ;;  %v4241_v1 = vld [vmem:[%s5347_s5 + $0x564] ss:$8 sps:$4 sm:$0xff]  }
 0x2fd   : > { %2190 = vmatpush1.bf16.msra.mxu1 %v4155_v23  ;;  %v4239_v23 = vld [vmem:[%s5347_s5 + $0x560] ss:$8 sps:$4 sm:$0xff]  }
 0x2fe   : > { %2191 = vmatprep.subr.bf16.mxu1 %v4160_v24  ;;  %v4244_v24 = vld [vmem:[%s5347_s5 + $0x574] ss:$8 sps:$4 sm:$0xff]  }
 0x301   : > { %2192 = vmatpush1.bf16.msra.mxu1 %v4158_v25  ;;  %v4242_v25 = vld [vmem:[%s5347_s5 + $0x570] ss:$8 sps:$4 sm:$0xff]  }
 0x302   : > { %2193 = vmatprep.subr.bf16.mxu1 %v4163_v26  ;;  %v4247_v26 = vld [vmem:[%s5347_s5 + $0x584] ss:$8 sps:$4 sm:$0xff]  }
 0x305   : > { %2194 = vmatpush1.bf16.msra.mxu1 %v4161_v27  ;;  %v4245_v27 = vld [vmem:[%s5347_s5 + $0x580] ss:$8 sps:$4 sm:$0xff]  }
 0x306   : > { %2195 = vmatprep.subr.bf16.mxu1 %v4166_v28  ;;  %v4250_v28 = vld [vmem:[%s5347_s5 + $0x594] ss:$8 sps:$4 sm:$0xff]  }
 0x309   : > { %2196 = vmatpush1.bf16.msra.mxu1 %v4164_v29  ;;  %v4248_v29 = vld [vmem:[%s5347_s5 + $0x590] ss:$8 sps:$4 sm:$0xff]  }
 0x30a   : > { %2197 = vmatprep.subr.bf16.mxu1 %v4169_v30 }
 0x30d   : > { %2198 = vmatpush1.bf16.msra.mxu1 %v4167_v31 }
 0x30e   : > { %2497 = vmatprep.subr.bf16.mxu1 %v4172_v32 }
 0x310   : > { %2214 = vmatmul.mubr.bf16.vlgmr.msra.gmra.mrb[16].mxu1 %v2085_v34 }
 0x311   : > { %2498 = vmatpush1.bf16.msra.mxu1 %v4170_v33  ;;  %3690 = vmatprep.mubr.msk.bf16.mxu1 %vm1728_vm13, %v2402_v36  ;;  %v3033_v36 = vshrl.u32 %v5003_v17, 16 }
 0x312   : > { %2499 = vmatprep.subr.bf16.mxu1 %v4175_v35 }
 0x315   : > { %2500 = vmatpush1.bf16.msra.mxu1 %v4173_v37 }
 0x316   : > { %2501 = vmatprep.subr.bf16.mxu1 %v4178_v38 }
 0x319   : > { %2502 = vmatpush1.bf16.msra.mxu1 %v4176_v40  ;;  %v4251_v40 = vld [vmem:[%s5349_s7] sm:$0xff]  }
 0x31a   : > { %2503 = vmatprep.subr.bf16.mxu1 %v4181_v41  ;;  %3302 = vmatpush1.bf16.msra.mxu0 %v4251_v40 }
 0x31b   : > { %3303 = vmatprep.subr.bf16.mxu0 %v4330_v3 }
 0x31d   : > { %2504 = vmatpush1.bf16.msra.mxu1 %v4179_v42 }
 0x31e   : > { %2505 = vmatprep.subr.bf16.mxu1 %v4184_v43 }
 0x321   : > { %2506 = vmatpush1.bf16.msra.mxu1 %v4182_v44 }
 0x322   : > { %2507 = vmatprep.subr.bf16.mxu1 %v4187_v45 }
 0x325   : > { %2508 = vmatpush1.bf16.msra.mxu1 %v4185_v46 }
 0x326   : > { %2509 = vmatprep.subr.bf16.mxu1 %v4190_v47 }
 0x329   : > { %2510 = vmatpush1.bf16.msra.mxu1 %v4188_v50 }
 0x32a   : > { %2511 = vmatprep.subr.bf16.mxu1 %v4193_v51 }
 0x32d   : > { %2512 = vmatpush1.bf16.msra.mxu1 %v4191_v53  ;;  %v4252_v53 = vld [vmem:[%s5349_s7 + $0x8] sm:$0xff]  }
 0x32e   : > { %2513 = vmatprep.subr.bf16.mxu1 %v4196_v54  ;;  %3304 = vmatpush1.bf16.msra.mxu0 %v4252_v53  ;;  %v4253_v54 = vld [vmem:[%s5349_s7 + $0x10] sm:$0xff]  }
 0x32f   : > { %3305 = vmatprep.subr.bf16.mxu0 %v4330_v3 }
 0x331   : > { %2514 = vmatpush1.bf16.msra.mxu1 %v4194_v55  ;;  %v4254_v55 = vld [vmem:[%s5349_s7 + $0x18] sm:$0xff]  }
 0x332   : > { %2813 = vmatprep.subr.bf16.mxu1 %v4199_v57  ;;  %3306 = vmatpush1.bf16.msra.mxu0 %v4253_v54  ;;  %v4255_v57 = vld [vmem:[%s5349_s7 + $0x20] sm:$0xff]  }
 0x333   : > { %3307 = vmatprep.subr.bf16.mxu0 %v4330_v3 }
 0x334   : > { %2530 = vmatmul.mubr.bf16.vlgmr.msra.gmra.mrb[20].mxu1 %v2401_v59  ;;  %v4257_v59 = vld [vmem:[%s5349_s7 + $0x30] sm:$0xff]  }
 0x335   : > { %2814 = vmatpush1.bf16.msra.mxu1 %v4197_v58  ;;  %3764 = vmatprep.mubr.msk.bf16.mxu1 %vm1728_vm13, %v2718_v61  ;;  %v4256_v58 = vld [vmem:[%s5349_s7 + $0x28] sm:$0xff]  }
 0x336   : > { %2815 = vmatprep.subr.bf16.mxu1 %v4202_v60  ;;  %3308 = vmatpush1.bf16.msra.mxu0 %v4254_v55  ;;  %v3217_v55 = vld [vmem:[%s5350_s8] sm:$0x1] }
 0x337   : > { %3309 = vmatprep.subr.bf16.mxu0 %v4330_v3 }
 0x339   : > { %2816 = vmatpush1.bf16.msra.mxu1 %v4200_v62 }
 0x33a   : > { %2817 = vmatprep.subr.bf16.mxu1 %v4205_v63  ;;  %3310 = vmatpush1.bf16.msra.mxu0 %v4255_v57 }
 0x33b   : > { %3311 = vmatprep.subr.bf16.mxu0 %v4330_v3 }
 0x33d   : > { %2818 = vmatpush1.bf16.msra.mxu1 %v4203_v2  ;;  %v4258_v2 = vld [vmem:[%s5349_s7 + $0x38] sm:$0xff]  }
 0x33e   : > { %2819 = vmatprep.subr.bf16.mxu1 %v4208_v52  ;;  %3312 = vmatpush1.bf16.msra.mxu0 %v4256_v58 }
 0x33f   : > { %3313 = vmatprep.subr.bf16.mxu0 %v4330_v3 }
 0x341   : > { %2820 = vmatpush1.bf16.msra.mxu1 %v4206_v4 }
 0x342   : > { %2821 = vmatprep.subr.bf16.mxu1 %v4211_v5  ;;  %3314 = vmatpush1.bf16.msra.mxu0 %v4257_v59 }
 0x343   : > { %3315 = vmatprep.subr.bf16.mxu0 %v4330_v3 }
 0x345   : > { %2822 = vmatpush1.bf16.msra.mxu1 %v4209_v0 }
 0x346   : > { %2823 = vmatprep.subr.bf16.mxu1 %v4214_v6  ;;  %3316 = vmatpush1.bf16.msra.mxu0 %v4258_v2 }
 0x347   : > { %3317 = vmatprep.subr.bf16.mxu0 %v4330_v3 }
 0x349   : > { %2824 = vmatpush1.bf16.msra.mxu1 %v4212_v7 }
 0x34a   : > { %2825 = vmatprep.subr.bf16.mxu1 %v4217_v8  ;;  %v4259_v8 = vld [vmem:[%s5349_s7 + $0x40] sm:$0xff]  }
 0x34b   : > { %3318 = vmatpush1.bf16.msra.mxu0 %v4259_v8 }
 0x34c   : > { %3319 = vmatprep.subr.bf16.mxu0 %v4330_v3 }
 0x34d   : > { %2826 = vmatpush1.bf16.msra.mxu1 %v4215_v9  ;;  %v4260_v9 = vld [vmem:[%s5349_s7 + $0x48] sm:$0xff]  }
 0x34e   : > { %2827 = vmatprep.subr.bf16.mxu1 %v4220_v10  ;;  %v4261_v10 = vld [vmem:[%s5349_s7 + $0x50] sm:$0xff]  }
 0x34f   : > { %3320 = vmatpush1.bf16.msra.mxu0 %v4260_v9 }
 0x350   : > { %3321 = vmatprep.subr.bf16.mxu0 %v4330_v3 }
 0x351   : > { %2828 = vmatpush1.bf16.msra.mxu1 %v4218_v11  ;;  %v4262_v11 = vld [vmem:[%s5349_s7 + $0x58] sm:$0xff]  }
 0x352   : > { %2829 = vmatprep.subr.bf16.mxu1 %v4223_v12  ;;  %v4263_v12 = vld [vmem:[%s5349_s7 + $0x60] ss:$0 sps:$4 sm:$0xff]  }
 0x353   : > { %3322 = vmatpush1.bf16.msra.mxu0 %v4261_v10 }
 0x354   : > { %3323 = vmatprep.subr.bf16.mxu0 %v4330_v3 }
 0x355   : > { %2830 = vmatpush1.bf16.msra.mxu1 %v4221_v48  ;;  %v3299_v48 = vsel %vm3297_vm14, %v4263_v12, 0 }
 0x356   : > { %3131 = vmatprep.subr.bf16.mxu1 %v4226_v13 }
 0x357   : > { %3324 = vmatpush1.bf16.msra.mxu0 %v4262_v11 }
 0x358   : > { %2846 = vmatmul.mubr.bf16.vlgmr.msra.gmra.mrb[24].mxu1 %v2717_v15  ;;  %3325 = vmatprep.subr.bf16.mxu0 %v4330_v3 }
 0x359   : > { %3132 = vmatpush1.bf16.msra.mxu1 %v4224_v14  ;;  %3838 = vmatprep.mubr.msk.bf16.mxu1 %vm1728_vm13, %v3035_v18 }
 0x35a   : > { %3133 = vmatprep.subr.bf16.mxu1 %v4229_v16 }
 0x35b   : > { %3326 = vmatpush1.bf16.msra.mxu0 %v3299_v48 }
 0x35d   : > { %3134 = vmatpush1.bf16.msra.mxu1 %v4227_v19 }
 0x35e   : > { %3135 = vmatprep.subr.bf16.mxu1 %v4232_v56 }
 0x361   : > { %3136 = vmatpush1.bf16.msra.mxu1 %v4230_v49 }
 0x362   : > { %3137 = vmatprep.subr.bf16.mxu1 %v4235_v39 }
 0x365   : > { %3138 = vmatpush1.bf16.msra.mxu1 %v4233_v20 }
 0x366   : > { %3139 = vmatprep.subr.bf16.mxu1 %v4238_v21 }
 0x369   : > { %3140 = vmatpush1.bf16.msra.mxu1 %v4236_v22 }
 0x36a   : > { %3141 = vmatprep.subr.bf16.mxu1 %v4241_v1 }
 0x36d   : > { %3142 = vmatpush1.bf16.msra.mxu1 %v4239_v23 }
 0x36e   : > { %3143 = vmatprep.subr.bf16.mxu1 %v4244_v24 }
 0x371   : > { %3144 = vmatpush1.bf16.msra.mxu1 %v4242_v25 }
 0x372   : > { %3145 = vmatprep.subr.bf16.mxu1 %v4247_v26 }
 0x375   : > { %3146 = vmatpush1.bf16.msra.mxu1 %v4245_v27 }
 0x376   : > { %3147 = vmatprep.subr.bf16.mxu1 %v4250_v28 }
 0x377   : > { %v1766_v30 = vpop.f32.mrb[4].mxu1  ;;  %v5225_v31 = vpop.f32.mrb[12].mxu0 }
 0x378   : > { %v1768_v32 = vpop.f32.mrb[5].mxu1  ;;  %v5227_v33 = vpop.f32.mrb[13].mxu0 }
 0x379   : > { %3148 = vmatpush1.bf16.msra.mxu1 %v4248_v29  ;;  %v1770_v34 = vpop.f32.mrb[6].mxu1  ;;  %v2377_v35 = vpop.f32.mrb[14].mxu0 }
 0x37a   : > { %v1771_v37 = vpop.f32.mrb[7].mxu1  ;;  %v2378_v38 = vpop.f32.mrb[15].mxu0  ;;  %v3176_v34 = vlaneseq }
 0x37c   : > { %3164 = vmatmul.mubr.bf16.vlgmr.msra.gmra.mrb[28].mxu1 %v3033_v36  ;;  %v3174_v36 = vld [vmem:[%s5348_s6] sm:$0x3] }
 0x39b   : > { %v1899_v41 = vpop.f32.mrb[8].mxu1  ;;  %v5234_v42 = vpop.f32.mrb[16].mxu0 }
 0x39c   : > { %v1900_v43 = vadd.f32 %v1899_v41, %v1766_v30  ;;  %v1901_v44 = vpop.f32.mrb[9].mxu1  ;;  %v5236_v45 = vpop.f32.mrb[17].mxu0 }
 0x39d   : > { %v1902_v46 = vadd.f32 %v1901_v44, %v1768_v32  ;;  %v1903_v47 = vpop.f32.mrb[10].mxu1  ;;  %v2693_v17 = vpop.f32.mrb[18].mxu0 }
 0x39e   : > { %v1904_v50 = vpop.f32.mrb[11].mxu1  ;;  %v2694_v51 = vpop.f32.mrb[19].mxu0 }
 0x3bf   : > { %v2057_v60 = vpop.f32.mrb[12].mxu1 }
 0x3c0   : > { %v2064_v61 = vadd.f32 %v2057_v60, %v1900_v43  ;;  %v3004_v62 = vpop.f32.mrb[20].mxu0  ;;  %v2059_v63 = vpop.f32.mrb[13].mxu1 }
 0x3c1   : > { %v2065_v52 = vadd.f32 %v2059_v63, %v1902_v46  ;;  %v3006_v4 = vpop.f32.mrb[21].mxu0  ;;  %v2061_v5 = vpop.f32.mrb[14].mxu1 }
 0x3c2   : > { %v3008_v0 = vpop.f32.mrb[22].mxu0  ;;  %v2062_v6 = vpop.f32.mrb[15].mxu1 }
 0x3c3   : > { %v3009_v7 = vpop.f32.mrb[23].mxu0 }
 0x3e3   : > { %v2215_v13 = vpop.f32.mrb[16].mxu1 }
 0x3e4   : > { %v2222_v14 = vadd.f32 %v2215_v13, %v2064_v61  ;;  %v2217_v15 = vpop.f32.mrb[17].mxu1 }
 0x3e5   : > { %v2223_v16 = vadd.f32 %v2217_v15, %v2065_v52  ;;  %v2219_v18 = vpop.f32.mrb[18].mxu1 }
 0x3e6   : > { %v2220_v19 = vpop.f32.mrb[19].mxu1  ;;  %v2380_v56 = vadd.f32 %v5225_v31, %v2222_v14 }
 0x3e7   : > { %v2381_v49 = vadd.f32 %v5227_v33, %v2223_v16  ;;  %v3177_v33 = vshrl.u32 %v3176_v34, 7 }
 0x3e9   : > { %v3178_v35 = vsub.s32 0, %v3177_v33  ;;  %v3182_v37 = vsub.s32 1, %v3177_v33 }
 0x3eb   : > { %v3179_v38 = vrot.slane %v3174_v36, %v3178_v35  ;;  %v3183_v41 = vrot.slane %v3174_v36, %v3182_v37 }
 0x407   : > { %v2531_v39 = vpop.f32.mrb[20].mxu1 }
 0x408   : > { %v2538_v20 = vadd.f32 %v2531_v39, %v2380_v56  ;;  %v2533_v3 = vpop.f32.mrb[21].mxu1 }
 0x409   : > { %v2539_v21 = vadd.f32 %v2533_v3, %v2381_v49  ;;  %v2535_v22 = vpop.f32.mrb[22].mxu1 }
 0x40a   : > { %v2536_v1 = vpop.f32.mrb[23].mxu1  ;;  %v2696_v23 = vadd.f32 %v5234_v42, %v2538_v20 }
 0x40b   : > { %v2697_v24 = vadd.f32 %v5236_v45, %v2539_v21 }
 0x42b   : > { %v2847_v25 = vpop.f32.mrb[24].mxu1 }
 0x42c   : > { %v2854_v26 = vadd.f32 %v2847_v25, %v2696_v23  ;;  %v2849_v27 = vpop.f32.mrb[25].mxu1 }
 0x42d   : > { %v2855_v28 = vadd.f32 %v2849_v27, %v2697_v24  ;;  %v2851_v29 = vpop.f32.mrb[26].mxu1 }
 0x42e   : > { %v2852_v30 = vpop.f32.mrb[27].mxu1  ;;  %v3011_v32 = vadd.f32 %v3004_v62, %v2854_v26 }
 0x42f   : > { %v3012_v31 = vadd.f32 %v3006_v4, %v2855_v28 }
 0x44f   : > { %v3165_v40 = vpop.f32.mrb[28].mxu1 }
 0x450   : > { %v3172_v42 = vadd.f32 %v3165_v40, %v3011_v32  ;;  %v3167_v43 = vpop.f32.mrb[29].mxu1 }
 0x451   : > { %v3173_v44 = vadd.f32 %v3167_v43, %v3012_v31  ;;  %v3169_v45 = vpop.f32.mrb[30].mxu1 }
 0x452   : > { %v3186_v46 = vadd.f32 %v3179_v38, %v3172_v42  ;;  %v3170_v47 = vpop.f32.mrb[31].mxu1 }
 0x453   : > { %v3187_v17 = vadd.f32 %v3183_v41, %v3173_v44 }
 0x454   : > { %v3188_v50 = vmax.f32 %v3186_v46, 0.0 }
 0x455   : > { %v3189_v51 = vmax.f32 %v3187_v17, 0.0 }
 0x456   : > { %v3190_v54 = vpack.c.bf16 %v3188_v50, %v3188_v50 }
 0x457   : > { %v3191_v53 = vpack.c.bf16 %v3189_v51, %v3189_v51 }
 0x459   : > { %3852 = vmatprep.mubr.msk.bf16.mxu0 %vm3293_vm15, %v3191_v53 }
 0x45a   : > { %3334 = vmatmul.mubr.bf16.vlgmr.msra.gmra.mrb[24].mxu0 %v3190_v54 }
 0x52d   : > { %v3335_v57 = vpop.f32.mrb[24].mxu0 }
 0x52e   : > { %v3336_v58 = vadd.f32 %v3335_v57, %v3217_v55  ;;  %v3337_v59 = vpop.f32.mrb[25].mxu0 }
 0x52f   : > { %v3338_v60 = vpop.f32.mrb[26].mxu0 }
 0x530   : > { %v3339_v61 = vpop.f32.mrb[27].mxu0  ;;  %3342 = vst.msk [vmem:[%s324_s26] sm:$0x1] %vm3341_vm0, %v3336_v58 }
 0x531   : > { %4277 = shalt.err (!%p4274_p3)
}
 0x532   : > { %s4278_s22 = scalar_lea.hbm %s5300_s14, 16  ;;  %s4282_s26 = scalar_lea.hbm %s5351_s9, 32 }
 0x533   : > { %p4279_p4 = scmp.ne.s32.totalorder %s5300_s14, %s4278_s22  ;;  %p4283_p9 = scmp.lt.u32.totalorder %s5300_s14, %s5351_s9 }
 0x534   : > { %p4284_p10 = scmp.lt.u32.totalorder %s4282_s26, %s4278_s22  ;;  %p4286_p12 = scmp.lt.u32.totalorder %s4278_s22, %s5300_s14 }
 0x535   : > { %p4280_p7 = pnand %p4279_p4, %p4428_p5 }
 0x536   : > { %p4285_p11 = por %p4284_p10, %p4283_p9 }
 0x537   : > { %p4281_p8 = pneg %p4280_p7 }
 0x538   : > { %p4287_p13 = por %p4286_p12, %p4285_p11 }
 0x53a   : > { %p4288_p0 = pnand %p4287_p13, %p4281_p8 }
 0x53c   : > { %4291 = shalt.err (!%p4288_p0)
}
 0x53d   : > { %3929 = dma.vmem_to_hbm [thread:$0]  (%p4428_p5), %s5302_s27, 16, %s5300_s14, %s3344_s13  }
 0x53e PF: > { %p3935_p1 = scmp.ge.s32.totalorder %s4326_s12, 2  ;;  %s3368_s16 = sand.u32 1, %s4314_s30  }
 0x53f   : > { %s3369_s17 = scalar_lea.sflag [#allocation4], %s3368_s16 }
 0x540   : > { %p3932_p2 = pnand %p3935_p1, %p4432_p6 }
 0x542   : > { %4309 = dma.done.wait (!%p3932_p2), %s3369_s17, 16  }
 0x543   : > { %4311 = vsyncadd (!%p3932_p2), %s3369_s17, 4294967280  ;;  %p19_p3 = scmp.ge.s32.totalorder %s4415_s15, 4   ;;  %s5356_s30 = smov %s4318_s10 }
 0x544   : > { %s5357_s10 = smov %s4322_s11  ;;  %s5358_s11 = smov %s4426_s18 }
 0x545   : > { %s5359_s12 = smov %s4415_s15  ;;  %21 = sbr.rel (!%p19_p3) target bundleno = 3 (0x3), region = 111 }
 0x54c   :  { %3373 = vsyncpa [#allocation4], 1 }
 0x54d   :  { %3375 = vsyncpa [#allocation4 + $0x1], 1 }

</bundles_post_ra>
